<compile_context>
chip_gen: v7x
topology: tpu7x:2x2x1
jax: 0.10.0
libtpu: 0.0.40
codegen_flags: <defaults>
</compile_context>

<pallas_src>
import functools

import jax
import jax.numpy as jnp
import numpy as np
from jax.experimental import pallas as pl
from jax.experimental.pallas import tpu as pltpu

_LOG2 = float(np.log(2.0))


def _dhn_loss_kernel(hi_ref, hj_ref, s_ref, m_out_ref, q_out_ref, acc_ref):
    j = pl.program_id(1)
    last_j = pl.num_programs(1) - 1

    hi = hi_ref[...].astype(jnp.float32)            # (tm, B) H row block
    hj = hj_ref[...].astype(jnp.float32)            # (tn, B) H col block
    s = s_ref[...].astype(jnp.float32)              # (tm, tn) S tile

    # Per-row-block init: reset the metric accumulator and compute the
    # quantization partial sum (depends only on the H row block) once per i.
    @pl.when(j == 0)
    def _init():
        q = jnp.abs(jnp.abs(hi) - 1.0)
        # stable log(cosh(x)) with x = |H| - 1: |x| - log(2) + log1p(e^{-2|x|})
        acc_ref[0] = jnp.float32(0.0)
        acc_ref[1] = jnp.sum(q - _LOG2 + jnp.log1p(jnp.exp(-2.0 * q)))

    # theta tile = (H_i @ H_j.T) / 2 -- contraction expressed directly so no
    # transpose/copy of the H tile is materialized; MXU with f32 accumulation.
    theta = jax.lax.dot_general(
        hi, hj,
        dimension_numbers=(((1,), (1,)), ((), ())),
        preferred_element_type=jnp.float32) * 0.5

    metric = (jnp.log1p(jnp.exp(-jnp.abs(theta)))
              + jnp.maximum(theta, 0.0)
              - s * theta)
    acc_ref[0] += jnp.sum(metric)

    # Per-row-block finalize: write the two partial sums as lane-dense tiles.
    @pl.when(j == last_j)
    def _finalize():
        m_out_ref[...] = jnp.full(m_out_ref.shape, acc_ref[0], dtype=jnp.float32)
        q_out_ref[...] = jnp.full(q_out_ref.shape, acc_ref[1], dtype=jnp.float32)


def _pick_tile(n, candidates):
    for t in candidates:
        if n % t == 0:
            return t
    return n   # full dimension is always a legal block extent


@functools.partial(jax.jit, static_argnums=(2,))
def dhn_loss(H, S, lamda):
    """Pallas implementation of DHNLoss(lamda)(H, S). Returns a f32 scalar."""
    N, B = H.shape
    assert S.shape == (N, N), (H.shape, S.shape)

    # Sublane-dim tile (multiple of 8) and lane-dim tile (multiple of 128),
    # falling back to the full dimension when N is small / not divisible.
    tm = _pick_tile(N, (256, 128, 64, 32, 16, 8))
    tn = _pick_tile(N, (512, 256, 128))
    gi, gj = N // tm, N // tn

    m_part, q_part = pl.pallas_call(
        _dhn_loss_kernel,
        out_shape=(jax.ShapeDtypeStruct((gi, 8, 128), jnp.float32),
                   jax.ShapeDtypeStruct((gi, 8, 128), jnp.float32)),
        grid_spec=pltpu.PrefetchScalarGridSpec(
            num_scalar_prefetch=0,
            grid=(gi, gj),
            in_specs=[
                pl.BlockSpec((tm, B), lambda i, j: (i, 0)),    # H row block (resident over j)
                pl.BlockSpec((tn, B), lambda i, j: (j, 0)),    # H col block (streamed)
                pl.BlockSpec((tm, tn), lambda i, j: (i, j)),   # S tile (streamed)
            ],
            out_specs=[
                pl.BlockSpec((1, 8, 128), lambda i, j: (i, 0, 0)),
                pl.BlockSpec((1, 8, 128), lambda i, j: (i, 0, 0)),
            ],
            scratch_shapes=[pltpu.SMEM((2,), jnp.float32)],
        ),
        compiler_params=pltpu.CompilerParams(
            dimension_semantics=("parallel", "arbitrary"),
            vmem_limit_bytes=32 * 1024 * 1024,
        ),
    )(H, H, S)

    inv_n2 = 1.0 / (float(N) * float(N))
    inv_nb = 1.0 / (float(N) * float(B))
    metric_total = jnp.sum(m_part[:, 0, 0])
    quant_total = jnp.sum(q_part[:, 0, 0])
    return metric_total * inv_n2 + jnp.float32(lamda) * quant_total * inv_nb


def dhn_loss_ref(H, S, lamda):
    """Pure-JAX reference (mirrors the PyTorch forward)."""
    Hf = H.astype(jnp.float32)
    Sf = S.astype(jnp.float32)
    theta = Hf @ Hf.T / 2.0
    metric_loss = jnp.mean(
        jnp.log1p(jnp.exp(-jnp.abs(theta))) + jnp.maximum(theta, 0.0) - Sf * theta
    )
    quant_loss = jnp.mean(jnp.log(jnp.cosh(jnp.abs(Hf) - 1.0)))
    return metric_loss + lamda * quant_loss


if __name__ == "__main__":
    lamda = 0.1
    key = jax.random.PRNGKey(0)

    # (N=384, bits=32) exercises the tiled 3x3 grid with 128x128 theta tiles;
    # (N=8, bits=32) exercises the small-shape full-dimension fallback.
    for (N, BITS) in ((384, 32), (8, 32)):
        k_h, k_s, key = jax.random.split(key, 3)
        H = jax.random.normal(k_h, (N, BITS), dtype=jnp.float32)
        S = (jax.random.uniform(k_s, (N, N)) > 0.5).astype(jnp.float32)

        loss = jax.block_until_ready(dhn_loss(H, S, lamda))
        loss_ref = jax.block_until_ready(dhn_loss_ref(H, S, lamda))
        np.testing.assert_allclose(np.asarray(loss), np.asarray(loss_ref),
                                   rtol=1e-5, atol=1e-5)

    print("KERNEL_OK")
</pallas_src>

<mosaic_0001>
module attributes {stable_mosaic.version = 11 : i64} {
  func.func @_dhn_loss_kernel(%arg0: i32, %arg1: i32, %arg2: memref<128x32xf32, #tpu.memory_space<vmem>>, %arg3: memref<128x32xf32, #tpu.memory_space<vmem>>, %arg4: memref<128x128xf32, #tpu.memory_space<vmem>>, %arg5: memref<1x8x128xf32, #tpu.memory_space<vmem>>, %arg6: memref<1x8x128xf32, #tpu.memory_space<vmem>>, %arg7: memref<2xf32, #tpu.memory_space<smem>>) attributes {dimension_semantics = [#tpu.dimension_semantics<parallel>, #tpu.dimension_semantics<arbitrary>], iteration_bounds = array<i64: 3, 3>, scalar_prefetch = 0 : i64, scratch_operands = 1 : i64, tpu.core_type = #tpu.core_type<tc>, window_params = [{transform_indices = @transform_0, window_bounds = array<i64: 128, 32>}, {transform_indices = @transform_1, window_bounds = array<i64: 128, 32>}, {transform_indices = @transform_2, window_bounds = array<i64: 128, 128>}, {transform_indices = @transform_3, window_bounds = array<i64: 1, 8, 128>}, {transform_indices = @transform_4, window_bounds = array<i64: 1, 8, 128>}]} {
    %c0 = arith.constant 0 : index
    %c0_0 = arith.constant 0 : index
    %0 = vector.load %arg2[%c0, %c0_0] : memref<128x32xf32, #tpu.memory_space<vmem>>, vector<128x32xf32>
    %c0_1 = arith.constant 0 : index
    %c0_2 = arith.constant 0 : index
    %1 = vector.load %arg3[%c0_1, %c0_2] : memref<128x32xf32, #tpu.memory_space<vmem>>, vector<128x32xf32>
    %c0_3 = arith.constant 0 : index
    %c0_4 = arith.constant 0 : index
    %2 = vector.load %arg4[%c0_3, %c0_4] : memref<128x128xf32, #tpu.memory_space<vmem>>, vector<128x128xf32>
    %c0_i32 = arith.constant 0 : i32
    %3 = arith.cmpi eq, %arg1, %c0_i32 : i32
    %4 = arith.extui %3 : i1 to i32
    %c0_i32_5 = arith.constant 0 : i32
    %5 = arith.cmpi ne, %4, %c0_i32_5 : i32
    scf.if %5 {
      %29 = math.absf %0 : vector<128x32xf32>
      %cst_13 = arith.constant 1.000000e+00 : f32
      %30 = vector.broadcast %cst_13 : f32 to vector<128x32xf32>
      %31 = arith.subf %29, %30 : vector<128x32xf32>
      %32 = math.absf %31 : vector<128x32xf32>
      %cst_14 = arith.constant 0.000000e+00 : f32
      %c0_15 = arith.constant 0 : index
      %33 = memref.load %arg7[%c0_15] : memref<2xf32, #tpu.memory_space<smem>>
      memref.store %cst_14, %arg7[%c0_15] : memref<2xf32, #tpu.memory_space<smem>>
      %cst_16 = arith.constant 0.693147182 : f32
      %34 = vector.broadcast %cst_16 : f32 to vector<128x32xf32>
      %35 = arith.subf %32, %34 : vector<128x32xf32>
      %cst_17 = arith.constant -2.000000e+00 : f32
      %36 = vector.broadcast %cst_17 : f32 to vector<128x32xf32>
      %37 = arith.mulf %36, %32 : vector<128x32xf32>
      %38 = math.exp %37 : vector<128x32xf32>
      %39 = math.log1p %38 : vector<128x32xf32>
      %40 = arith.addf %35, %39 : vector<128x32xf32>
      %41 = vector.shape_cast %40 : vector<128x32xf32> to vector<1x128x32xf32>
      %cst_18 = arith.constant dense<0.000000e+00> : vector<1xf32>
      %42 = vector.multi_reduction <add>, %41, %cst_18 [1, 2] : vector<1x128x32xf32> to vector<1xf32>
      %43 = vector.shape_cast %42 : vector<1xf32> to vector<1x1x1xf32>
      %44 = vector.extract %43[0, 0, 0] : f32 from vector<1x1x1xf32>
      %c1 = arith.constant 1 : index
      %45 = memref.load %arg7[%c1] : memref<2xf32, #tpu.memory_space<smem>>
      memref.store %44, %arg7[%c1] : memref<2xf32, #tpu.memory_space<smem>>
    } else {
    }
    %cst = arith.constant dense<0.000000e+00> : vector<128x128xf32>
    %6 = tpu.matmul %0, %1, %cst {dimension_numbers = #tpu.dot_dimension_numbers<[1], [1], [0], [0], [0, 0, 1, 0], [], []>} : vector<128x32xf32>, vector<128x32xf32>, vector<128x128xf32> -> vector<128x128xf32>
    %cst_6 = arith.constant 5.000000e-01 : f32
    %7 = vector.broadcast %cst_6 : f32 to vector<128x128xf32>
    %8 = arith.mulf %6, %7 : vector<128x128xf32>
    %9 = math.absf %8 : vector<128x128xf32>
    %cst_7 = arith.constant 0.000000e+00 : f32
    %10 = vector.broadcast %cst_7 : f32 to vector<128x128xf32>
    %11 = arith.subf %10, %9 : vector<128x128xf32>
    %12 = math.exp %11 : vector<128x128xf32>
    %13 = math.log1p %12 : vector<128x128xf32>
    %cst_8 = arith.constant 0.000000e+00 : f32
    %14 = vector.broadcast %cst_8 : f32 to vector<128x128xf32>
    %15 = arith.maximumf %8, %14 : vector<128x128xf32>
    %16 = arith.addf %13, %15 : vector<128x128xf32>
    %17 = arith.mulf %2, %8 : vector<128x128xf32>
    %18 = arith.subf %16, %17 : vector<128x128xf32>
    %c0_9 = arith.constant 0 : index
    %19 = memref.load %arg7[%c0_9] : memref<2xf32, #tpu.memory_space<smem>>
    %20 = vector.shape_cast %18 : vector<128x128xf32> to vector<1x128x128xf32>
    %cst_10 = arith.constant dense<0.000000e+00> : vector<1xf32>
    %21 = vector.multi_reduction <add>, %20, %cst_10 [1, 2] : vector<1x128x128xf32> to vector<1xf32>
    %22 = vector.shape_cast %21 : vector<1xf32> to vector<1x1x1xf32>
    %23 = vector.extract %22[0, 0, 0] : f32 from vector<1x1x1xf32>
    %24 = arith.addf %19, %23 : f32
    %c0_11 = arith.constant 0 : index
    %25 = memref.load %arg7[%c0_11] : memref<2xf32, #tpu.memory_space<smem>>
    memref.store %24, %arg7[%c0_11] : memref<2xf32, #tpu.memory_space<smem>>
    %c2_i32 = arith.constant 2 : i32
    %26 = arith.cmpi eq, %arg1, %c2_i32 : i32
    %27 = arith.extui %26 : i1 to i32
    %c0_i32_12 = arith.constant 0 : i32
    %28 = arith.cmpi ne, %27, %c0_i32_12 : i32
    scf.if %28 {
      %c0_13 = arith.constant 0 : index
      %29 = memref.load %arg7[%c0_13] : memref<2xf32, #tpu.memory_space<smem>>
      %30 = vector.broadcast %29 : f32 to vector<1x8x128xf32>
      %c0_14 = arith.constant 0 : index
      %c0_15 = arith.constant 0 : index
      %c0_16 = arith.constant 0 : index
      %31 = vector.load %arg5[%c0_14, %c0_15, %c0_16] : memref<1x8x128xf32, #tpu.memory_space<vmem>>, vector<1x8x128xf32>
      tpu.vector_store %arg5[%c0_14, %c0_15, %c0_16], %30 {strides = array<i32>} : memref<1x8x128xf32, #tpu.memory_space<vmem>>, vector<1x8x128xf32>,
      %c1 = arith.constant 1 : index
      %32 = memref.load %arg7[%c1] : memref<2xf32, #tpu.memory_space<smem>>
      %33 = vector.broadcast %32 : f32 to vector<1x8x128xf32>
      %c0_17 = arith.constant 0 : index
      %c0_18 = arith.constant 0 : index
      %c0_19 = arith.constant 0 : index
      %34 = vector.load %arg6[%c0_17, %c0_18, %c0_19] : memref<1x8x128xf32, #tpu.memory_space<vmem>>, vector<1x8x128xf32>
      tpu.vector_store %arg6[%c0_17, %c0_18, %c0_19], %33 {strides = array<i32>} : memref<1x8x128xf32, #tpu.memory_space<vmem>>, vector<1x8x128xf32>,
    } else {
    }
    return
  }
  func.func @transform_0(%arg0: i32, %arg1: i32) -> (i32, i32) {
    %c0_i32 = arith.constant 0 : i32
    %c0_i32_0 = arith.constant 0 : i32
    return %arg0, %c0_i32 : i32, i32
  }
  func.func @transform_1(%arg0: i32, %arg1: i32) -> (i32, i32) {
    %c0_i32 = arith.constant 0 : i32
    %c0_i32_0 = arith.constant 0 : i32
    return %arg1, %c0_i32 : i32, i32
  }
  func.func @transform_2(%arg0: i32, %arg1: i32) -> (i32, i32) {
    %c0_i32 = arith.constant 0 : i32
    return %arg0, %arg1 : i32, i32
  }
  func.func @transform_3(%arg0: i32, %arg1: i32) -> (i32, i32, i32) {
    %c0_i32 = arith.constant 0 : i32
    %c0_i32_0 = arith.constant 0 : i32
    %c0_i32_1 = arith.constant 0 : i32
    return %arg0, %c0_i32, %c0_i32_0 : i32, i32, i32
  }
  func.func @transform_4(%arg0: i32, %arg1: i32) -> (i32, i32, i32) {
    %c0_i32 = arith.constant 0 : i32
    %c0_i32_0 = arith.constant 0 : i32
    %c0_i32_1 = arith.constant 0 : i32
    return %arg0, %c0_i32, %c0_i32_0 : i32, i32, i32
  }
}

</mosaic_0001>

<bundles_post_ra>
// kernel: dhn_loss.1
= control target key start
LH: loop header
LB: loop body
LE: loop exit
PB: predicated region body
PF: predicated region fallthrough
CT: control target
= control target key end

     0   :  { %10 = vsyncpa [#allocation4], 0  ;;  %s3016_s0 = inlined_call_operand.vmem [shape: f32[384,32], index: 0, kind: input, shape index: {}, may-alias: {0,1}]   ;;  %s3017_s1 = inlined_call_operand.vmem [shape: f32[384,32], index: 1, kind: input, shape index: {}, may-alias: {0,1}]   ;;  %s3018_s2 = inlined_call_operand.hbm [shape: f32[384,384], index: 2, kind: input, shape index: {}]   ;;  %s3019_s3 = inlined_call_operand.vmem [shape: f32[3,8,128], index: 3, kind: output, shape index: {0}]   ;;  %s3020_s4 = inlined_call_operand.vmem [shape: f32[3,8,128], index: 4, kind: output, shape index: {1}]  }
   0x1   :  { %12 = vsyncpa [#allocation4 + $0x1], 0  ;;  %s1931_s15 = smov 0   ;;  %s1933_s16 = smov 0  }
   0x2   :  { %s1935_s17 = smov 0   ;;  %s1937_s18 = smov 0  }
   0x3   :  { %s1939_s19 = smov 0   ;;  %s1941_s20 = smov 0  }
   0x4   :  { %s1943_s21 = smov 0   ;;  %s1945_s22 = smov 0  }
   0x5 LB: > { %s1358_s23 = sadd.s32 4294967295, %s1899_s22   ;;  %s27_s24 = sadd.s32 1, %s1891_s20  ;;  %s1899_s22 = sphi %s1945_s22, %s18_s22   ;;  %s1895_s21 = sphi %s1943_s21, %s3223_s21   ;;  %s1891_s20 = sphi %s1941_s20, %s3222_s20   ;;  %s1887_s19 = sphi %s1939_s19, %s3221_s19   ;;  %s1883_s18 = sphi %s1937_s18, %s3220_s18   ;;  %s1879_s17 = sphi %s1935_s17, %s3219_s17   ;;  %s1875_s16 = sphi %s1933_s16, %s3218_s16   ;;  %s1871_s15 = sphi %s1931_s15, %s3217_s15  }
   0x6   : > { %p28_p0 = scmp.ge.s32.totalorder %s27_s24, 3  ;;  %s30_s25 = sadd.s32 1, %s1895_s21 }
   0x7   : > { %s91_s26 = sadd.s32 1, %s1879_s17  ;;  %p98_p1 = scmp.ne.s32.totalorder %s1879_s17, %s1875_s16 }
   0x8   : > { %s3225_s24 = smov (%p28_p0, %s27_s24), 0  ;;  %s3227_s25 = smov (!%p28_p0, %s30_s25), %s1895_s21 }
   0x9   : > { %s87_s27 = ssub.s32 %s1891_s20, %s3225_s24  ;;  %p99_p2 = scmp.eq.s32.totalorder %s1899_s22, 0 }
   0xa   : > { %p32_p3 = scmp.ge.s32.totalorder %s3227_s25, 3  ;;  %p104_p4 = scmp.ne.s32.totalorder %s1875_s16, %s1871_s15 }
   0xb   : > { %p1982_p5 = por %p99_p2, %p98_p1  ;;  %p105_p6 = scmp.eq.s32.totalorder %s1358_s23, 0 }
   0xc   : > { %s3229_s25 = smov (%p32_p3, %s3227_s25), 0  ;;  %p1606_p8 = scmp.lt.s32.totalorder %s1899_s22, 9 }
   0xd   : > { %p1988_p7 = por %p105_p6, %p104_p4  ;;  %s86_s30 = ssub.s32 %s1895_s21, %s3229_s25 }
   0xe   : > { %s88_s5 = sor.u32 %s87_s27, %s86_s30  ;;  %s198_s6 = sand.u32 1, %s1879_s17  }
   0xf   : > { %p89_p9 = scmp.eq.s32.totalorder %s88_s5, 0  ;;  %s1362_s7 = sshll.u32 %s198_s6, 7 }
  0x10   : > { %s1595_s8 = smul.u32 48, %s1895_s21  ;;  %s202_s12 = scalar_lea.vmem [#allocation3], %s1362_s7 }
  0x11   : > { %s1998_s9 = scalar_select %p89_p9, %s1879_s17, %s91_s26  }
  0x12   : > { %s208_s10 = sadd.s32 %s1891_s20, %s1595_s8  ;;  %s211_s13 = sshll.u32 %s202_s12, 4  ;;  %s2006_s13 = int_to_ptr.vmem [resolvable:$true] %s211_s13 }
  0x13   : > { %s1365_s11 = sshll.u32 %s208_s10, 7  ;;  %p2012_p10 = pnand %p1606_p8, %p1982_p5 }
  0x14   : > { %s2004_s23 = scalar_lea.hbm %s3018_s2, %s1365_s11  ;;  %s2017_s27 = scalar_lea.sflag [#allocation4], %s198_s6 }
  0x15   : > { %s1803_s30 = scalar_lea.hbm %s2004_s23, 2048  ;;  %p1805_p13 = pneg %p2012_p10 }
  0x16   : > { %p1804_p12 = scmp.ne.s32.totalorder %s2004_s23, %s1803_s30  ;;  %s1808_s7 = scalar_lea.hbm %s3018_s2, 18432 }
  0x17   : > { %p1809_p2 = scmp.lt.u32.totalorder %s2004_s23, %s3018_s2  ;;  %p1810_p3 = scmp.lt.u32.totalorder %s1808_s7, %s1803_s30 }
  0x18   : > { %p1806_p0 = pnand %p1805_p13, %p1804_p12  ;;  %p1812_p5 = scmp.lt.u32.totalorder %s1803_s30, %s2004_s23 }
  0x19   : > { %p1811_p4 = por %p1810_p3, %p1809_p2 }
  0x1a   : > { %p1807_p1 = pneg %p1806_p0 }
  0x1b   : > { %p1813_p6 = por %p1812_p5, %p1811_p4 }
  0x1d   : > { %p1814_p8 = pnand %p1813_p6, %p1807_p1 }
  0x1f   : > { %1817 = shalt.err (!%p1814_p8)
}
  0x20   : > { %s1818_s6 = scalar_lea.vmem %s2006_s13, 2048  ;;  %s1901_s11 = smov [#allocation3]  }
  0x21   : > { %p1819_p9 = scmp.ne.s32.totalorder %s2006_s13, %s1818_s6  ;;  %s1823_s12 = sshll.u32 %s1901_s11, 4  ;;  %s1824_s12 = int_to_ptr.vmem [resolvable:$false] %s1823_s12 }
  0x22   : > { %s1825_s14 = scalar_lea.vmem %s1824_s12, 4096  ;;  %p1826_p11 = scmp.lt.s32.totalorder %s2006_s13, %s1824_s12 }
  0x23   : > { %p1821_p12 = pnand %p1819_p9, %p1805_p13  ;;  %p1827_p2 = scmp.lt.s32.totalorder %s1825_s14, %s1818_s6 }
  0x25   : > { %p1822_p0 = pneg %p1821_p12  ;;  %p1828_p3 = por %p1827_p2, %p1826_p11 }
  0x27   : > { %p1829_p4 = pnand %p1828_p3, %p1822_p0 }
  0x29   : > { %1832 = shalt.err (!%p1829_p4)
}
  0x2a   : > { %s1902_s15 = smov 384   ;;  %s1903_s30 = smov 128  }
  0x2b   : > { %s1904_s5 = smov 8   ;;  %p219_p13 = scmp.lt.s32.totalorder %s1899_s22, 10 }
  0x2c   : > { %1605 = dma.hbm_to_vmem [thread:$0]  (!%p2012_p10), %s2004_s23, 2048, %s2006_s13, %s2017_s27, %s1902_s15, %s1903_s30, %s1904_s5  }
  0x2d   : > { %p3041_p1 = scmp.ge.s32.totalorder %s1899_s22, 1 }
  0x2f   : > { %p220_p5 = pnand %p3041_p1, %p219_p13 }
  0x31   : > { %223 = sbr.rel (%p220_p5) target bundleno = 963 (0x3c3), region = 32 }
  0x38   : > { %s225_s28 = sand.u32 1, %s1875_s16  }
  0x39   : > { %s1367_s7 = sshll.u32 %s225_s28, 7  ;;  %s226_s8 = scalar_lea.sflag [#allocation4], %s225_s28 }
  0x3a   : > { %s2049_s10 = scalar_lea.vmem [#allocation3], %s1367_s7 }
  0x3b   : > { %1866 = dma.done.wait (%p1988_p7), %s226_s8, 2048  }
  0x3c   : > { %1868 = vsyncadd (%p1988_p7), %s226_s8, 4294965248  ;;  %s1368_s13 = sshll.u32 %s1887_s19, 4  ;;  %s1370_s23 = sshll.u32 %s1883_s18, 4  ;;  %v2140_v32 = vld [vmem:[%s2049_s10] sm:$0xff]  ;;  %v2143_v33 = vld [vmem:[%s2049_s10 + $0x8] sm:$0xff] }
  0x3d   : > { %p268_p10 = scmp.lt.s32.totalorder %s1368_s13, 47  ;;  %p274_p11 = scmp.lt.s32.totalorder %s1370_s23, 47  ;;  %3072 = vst [vmem:[#allocation36_spill] sm:$0xff] %v2140_v32  ;;  %3073 = vst [vmem:[#allocation37_spill] sm:$0xff] %v2143_v33  ;;  %v2146_v34 = vld [vmem:[%s2049_s10 + $0x10] sm:$0xff]  ;;  %v2149_v35 = vld [vmem:[%s2049_s10 + $0x18] sm:$0xff] }
  0x3e   : > { %p280_p6 = scmp.lt.s32.totalorder %s1887_s19, 2  ;;  %3074 = vst [vmem:[#allocation38_spill] sm:$0xff] %v2146_v34  ;;  %3075 = vst [vmem:[#allocation39_spill] sm:$0xff] %v2149_v35  ;;  %v2152_v36 = vld [vmem:[%s2049_s10 + $0x20] sm:$0xff]  ;;  %v2155_v37 = vld [vmem:[%s2049_s10 + $0x28] sm:$0xff]  ;;  %p1374_p7 = scmp.ne.s32.totalorder %s1883_s18, 0 }
  0x3f   : > { %s3231_s13 = smov (!%p268_p10, %s1368_s13), 47  ;;  %s3233_s23 = smov (!%p274_p11, %s1370_s23), 47  ;;  %3076 = vst [vmem:[#allocation40_spill] sm:$0xff] %v2152_v36  ;;  %3077 = vst [vmem:[#allocation41_spill] sm:$0xff] %v2155_v37  ;;  %v2158_v38 = vld [vmem:[%s2049_s10 + $0x30] sm:$0xff]  ;;  %v2161_v39 = vld [vmem:[%s2049_s10 + $0x38] sm:$0xff] }
  0x40   : > { %s1369_s26 = sshll.u32 %s3231_s13, 3  ;;  %s1371_s12 = sshll.u32 %s3233_s23, 3  ;;  %3078 = vst [vmem:[#allocation42_spill] sm:$0xff] %v2158_v38  ;;  %3079 = vst [vmem:[#allocation43_spill] sm:$0xff] %v2161_v39  ;;  %v2164_v40 = vld [vmem:[%s2049_s10 + $0x40] sm:$0xff]  ;;  %v2167_v41 = vld [vmem:[%s2049_s10 + $0x48] sm:$0xff] }
  0x41   : > { %s271_s11 = scalar_lea.vmem %s3016_s0, %s1369_s26  ;;  %s3235_s19 = smov (!%p280_p6, %s1887_s19), 2  ;;  %3080 = vst [vmem:[#allocation44_spill] sm:$0xff] %v2164_v40  ;;  %3081 = vst [vmem:[#allocation45_spill] sm:$0xff] %v2167_v41  ;;  %v2170_v42 = vld [vmem:[%s2049_s10 + $0x50] sm:$0xff]  ;;  %v2173_v43 = vld [vmem:[%s2049_s10 + $0x58] sm:$0xff]  ;;  %vm614_vm7 = vcmask (!%p1374_p7), 261120  }
  0x42   : > { %v2061_v0 = vld [vmem:[%s271_s11] sm:$0xff]  ;;  %v2063_v1 = vld [vmem:[%s271_s11 + $0x8] sm:$0xff]  ;;  %v2065_v2 = vld [vmem:[%s271_s11 + $0x10] sm:$0xff]  ;;  %s277_s15 = scalar_lea.vmem %s3017_s1, %s1371_s12  ;;  %s1372_s30 = sshll.u32 %s3235_s19, 3  ;;  %3082 = vst [vmem:[#allocation46_spill] sm:$0xff] %v2170_v42 }
  0x43   : > { %3042 = vst [vmem:[#allocation6_spill] sm:$0xff] %v2061_v0  ;;  %3043 = vst [vmem:[#allocation7_spill] sm:$0xff] %v2063_v1  ;;  %v2067_v3 = vld [vmem:[%s271_s11 + $0x18] sm:$0xff]  ;;  %v2069_v4 = vld [vmem:[%s271_s11 + $0x20] sm:$0xff]  ;;  %s2098_s7 = scalar_lea.vmem %s3019_s3, %s1372_s30  ;;  %s2103_s23 = scalar_lea.vmem %s3020_s4, %s1372_s30  ;;  %v340_v48 = vand.u32 (!%p1374_p7), 2147483647, %v2061_v0 }
  0x44   : > { %3044 = vst [vmem:[#allocation8_spill] sm:$0xff] %v2065_v2  ;;  %3045 = vst [vmem:[#allocation9_spill] sm:$0xff] %v2067_v3  ;;  %v2071_v5 = vld [vmem:[%s271_s11 + $0x28] sm:$0xff]  ;;  %v2077_v6 = vld [vmem:[%s271_s11 + $0x30] sm:$0xff]  ;;  %s1905_s19 = smov (!%p1374_p7), 0.0  }
  0x45   : > { %3046 = vst [vmem:[#allocation10_spill] sm:$0xff] %v2069_v4  ;;  %3047 = vst [vmem:[#allocation11_spill] sm:$0xff] %v2071_v5  ;;  %v2079_v7 = vld [vmem:[%s271_s11 + $0x38] sm:$0xff]  ;;  %v2081_v8 = vld [vmem:[%s271_s11 + $0x40] sm:$0xff]  ;;  %389 = sst [smem:[#allocation2]] (!%p1374_p7), %s1905_s19  ;;  %v2193_v53 = vadd.f32 (!%p1374_p7), -1.0, %v340_v48 }
  0x46   : > { %3048 = vst [vmem:[#allocation12_spill] sm:$0xff] %v2077_v6  ;;  %3049 = vst [vmem:[#allocation13_spill] sm:$0xff] %v2079_v7  ;;  %v2083_v9 = vld [vmem:[%s271_s11 + $0x48] sm:$0xff]  ;;  %v2085_v10 = vld [vmem:[%s271_s11 + $0x50] sm:$0xff]  ;;  %v341_v49 = vand.u32 (!%p1374_p7), 2147483647, %v2063_v1 }
  0x47   : > { %3050 = vst [vmem:[#allocation14_spill] sm:$0xff] %v2081_v8  ;;  %3051 = vst [vmem:[#allocation15_spill] sm:$0xff] %v2083_v9  ;;  %v2087_v11 = vld [vmem:[%s271_s11 + $0x58] sm:$0xff]  ;;  %v2089_v12 = vld [vmem:[%s271_s11 + $0x60] sm:$0xff]  ;;  %v342_v50 = vand.u32 (!%p1374_p7), 2147483647, %v2065_v2 }
  0x48   : > { %3052 = vst [vmem:[#allocation16_spill] sm:$0xff] %v2085_v10  ;;  %3053 = vst [vmem:[#allocation17_spill] sm:$0xff] %v2087_v11  ;;  %v2091_v13 = vld [vmem:[%s271_s11 + $0x68] sm:$0xff]  ;;  %v2093_v14 = vld [vmem:[%s271_s11 + $0x70] sm:$0xff]  ;;  %v343_v51 = vand.u32 (!%p1374_p7), 2147483647, %v2067_v3 }
  0x49   : > { %3054 = vst [vmem:[#allocation18_spill] sm:$0xff] %v2089_v12  ;;  %3055 = vst [vmem:[#allocation19_spill] sm:$0xff] %v2091_v13  ;;  %v2105_v15 = vld [vmem:[%s271_s11 + $0x78] sm:$0xff]  ;;  %v2107_v16 = vld [vmem:[%s277_s15] sm:$0xff]  ;;  %v344_v52 = vand.u32 (!%p1374_p7), 2147483647, %v2069_v4 }
  0x4a   : > { %3056 = vst [vmem:[#allocation20_spill] sm:$0xff] %v2093_v14  ;;  %3057 = vst [vmem:[#allocation21_spill] sm:$0xff] %v2105_v15  ;;  %v2109_v17 = vld [vmem:[%s277_s15 + $0x8] sm:$0xff]  ;;  %v2111_v18 = vld [vmem:[%s277_s15 + $0x10] sm:$0xff]  ;;  %v2195_v54 = vadd.f32 (!%p1374_p7), -1.0, %v341_v49  ;;  %v2198_v56 = vadd.f32 (!%p1374_p7), -1.0, %v342_v50 }
  0x4b   : > { %3058 = vst [vmem:[#allocation22_spill] sm:$0xff] %v2111_v18  ;;  %v2113_v19 = vld [vmem:[%s277_s15 + $0x18] sm:$0xff]  ;;  %v2115_v20 = vld [vmem:[%s277_s15 + $0x20] sm:$0xff]  ;;  %v2117_v21 = vld [vmem:[%s277_s15 + $0x28] sm:$0xff]  ;;  %v345_v55 = vand.u32 (!%p1374_p7), 2147483647, %v2071_v5 }
  0x4c   : > { %3059 = vst [vmem:[#allocation23_spill] sm:$0xff] %v2113_v19  ;;  %3060 = vst [vmem:[#allocation24_spill] sm:$0xff] %v2115_v20  ;;  %v2119_v22 = vld [vmem:[%s277_s15 + $0x30] sm:$0xff]  ;;  %v2121_v23 = vld [vmem:[%s277_s15 + $0x38] sm:$0xff]  ;;  %v2200_v57 = vadd.f32 (!%p1374_p7), -1.0, %v343_v51  ;;  %v2203_v59 = vadd.f32 (!%p1374_p7), -1.0, %v344_v52 }
  0x4d   : > { %3061 = vst [vmem:[#allocation25_spill] sm:$0xff] %v2117_v21  ;;  %3062 = vst [vmem:[#allocation26_spill] sm:$0xff] %v2119_v22  ;;  %v2123_v24 = vld [vmem:[%s277_s15 + $0x40] sm:$0xff]  ;;  %v2125_v25 = vld [vmem:[%s277_s15 + $0x48] sm:$0xff]  ;;  %v346_v58 = vand.u32 (!%p1374_p7), 2147483647, %v2077_v6 }
  0x4e   : > { %3063 = vst [vmem:[#allocation27_spill] sm:$0xff] %v2121_v23  ;;  %3064 = vst [vmem:[#allocation28_spill] sm:$0xff] %v2123_v24  ;;  %v2127_v26 = vld [vmem:[%s277_s15 + $0x50] sm:$0xff]  ;;  %v2129_v27 = vld [vmem:[%s277_s15 + $0x58] sm:$0xff]  ;;  %339 = sbr.rel (%p1374_p7) target bundleno = 373 (0x175), region = 40  ;;  %v2209_v48 = vadd.f32 (!%p1374_p7), -1.0, %v345_v55 }
  0x4f   : > { %3065 = vst [vmem:[#allocation29_spill] sm:$0xff] %v2125_v25  ;;  %3066 = vst [vmem:[#allocation30_spill] sm:$0xff] %v2127_v26  ;;  %v2131_v28 = vld [vmem:[%s277_s15 + $0x60] sm:$0xff]  ;;  %v2133_v29 = vld [vmem:[%s277_s15 + $0x68] sm:$0xff]  ;;  %v347_v61 = vand.u32 (!%p1374_p7), 2147483647, %v2079_v7 }
  0x50   : > { %3067 = vst [vmem:[#allocation31_spill] sm:$0xff] %v2129_v27  ;;  %3068 = vst [vmem:[#allocation32_spill] sm:$0xff] %v2131_v28  ;;  %v2135_v30 = vld [vmem:[%s277_s15 + $0x70] sm:$0xff]  ;;  %v2137_v31 = vld [vmem:[%s277_s15 + $0x78] sm:$0xff]  ;;  %v348_v63 = vand.u32 (!%p1374_p7), 2147483647, %v2081_v8 }
  0x51   : > { %3069 = vst [vmem:[#allocation33_spill] sm:$0xff] %v2133_v29  ;;  %3070 = vst [vmem:[#allocation34_spill] sm:$0xff] %v2135_v30  ;;  %v2176_v44 = vld [vmem:[%s2049_s10 + $0x60] sm:$0xff]  ;;  %v2179_v45 = vld [vmem:[%s2049_s10 + $0x68] sm:$0xff]  ;;  %v349_v50 = vand.u32 (!%p1374_p7), 2147483647, %v2083_v9 }
  0x52   : > { %3071 = vst [vmem:[#allocation35_spill] sm:$0xff] %v2137_v31  ;;  %3083 = vst [vmem:[#allocation47_spill] sm:$0xff] %v2173_v43  ;;  %v2182_v46 = vld [vmem:[%s2049_s10 + $0x70] sm:$0xff]  ;;  %v2185_v47 = vld [vmem:[%s2049_s10 + $0x78] sm:$0xff]  ;;  %v2215_v52 = vadd.f32 (!%p1374_p7), -1.0, %v346_v58  ;;  %v2226_v38 = vadd.f32 (!%p1374_p7), -1.0, %v348_v63 }
  0x53   : > { %3084 = vst [vmem:[#allocation48_spill] sm:$0xff] %v2176_v44  ;;  %3085 = vst [vmem:[#allocation49_spill] sm:$0xff] %v2179_v45  ;;  %v351_v62 = vand.u32 (!%p1374_p7), 2147483647, %v2087_v11  ;;  %v2221_v44 = vadd.f32 (!%p1374_p7), -1.0, %v347_v61  ;;  %v2233_v36 = vadd.f32 (!%p1374_p7), -1.0, %v349_v50 }
  0x54   : > { %3086 = vst [vmem:[#allocation50_spill] sm:$0xff] %v2182_v46  ;;  %3087 = vst [vmem:[#allocation51_spill] sm:$0xff] %v2185_v47  ;;  %v350_v47 = vand.u32 (!%p1374_p7), 2147483647, %v2085_v10  ;;  %v3088_v46 = vand.u32 (!%p1374_p7), 2147483647, %v2193_v53 }
  0x55   : > { %v3089_v55 = vand.u32 2147483647, %v2195_v54  ;;  %v352_v39 = vand.u32 2147483647, %v2089_v12  ;;  %v3090_v58 = vand.u32 2147483647, %v2198_v56 }
  0x56   : > { %v406_v45 = vmul.f32 -2.0, %v3088_v46  ;;  %v353_v60 = vand.u32 2147483647, %v2091_v13  ;;  %v354_v46 = vand.u32 2147483647, %v2093_v14  ;;  %v2237_v43 = vadd.f32 -1.0, %v350_v47 }
  0x57   : > { %v407_v49 = vmul.f32 -2.0, %v3089_v55  ;;  %v408_v42 = vmul.f32 -2.0, %v3090_v58  ;;  %v3091_v61 = vand.u32 2147483647, %v2200_v57  ;;  %v3092_v63 = vand.u32 2147483647, %v2203_v59 }
  0x58   : > { %v422_v51 = vmul.f32 1.442695, %v406_v45  ;;  %v2242_v41 = vadd.f32 -1.0, %v351_v62  ;;  %v2245_v34 = vadd.f32 -1.0, %v352_v39  ;;  %v3093_v32 = vand.u32 2147483647, %v2209_v48 }
  0x59   : > { %v409_v37 = vmul.f32 -2.0, %v3091_v61  ;;  %v410_v40 = vmul.f32 -2.0, %v3092_v63  ;;  %v424_v35 = vmul.f32 1.442695, %v407_v49  ;;  %v426_v47 = vmul.f32 1.442695, %v408_v42 }
  0x5a   : > { %v411_v61 = vmul.f32 -2.0, %v3093_v32  ;;  %v2250_v33 = vadd.f32 -1.0, %v353_v60  ;;  %v2252_v55 = vadd.f32 -1.0, %v354_v46  ;;  %v3094_v58 = vand.u32 2147483647, %v2215_v52 }
  0x5b   : > { %v428_v45 = vmul.f32 1.442695, %v409_v37  ;;  %1675 = vpow2.f32 %v422_v51  ;;  %v430_v39 = vmul.f32 1.442695, %v410_v40  ;;  %v355_v50 = vand.u32 2147483647, %v2105_v15 }
  0x5c   : > { %v412_v49 = vmul.f32 -2.0, %v3094_v58  ;;  %v3095_v32 = vand.u32 2147483647, %v2221_v44  ;;  %1677 = vpow2.f32 %v424_v35  ;;  %v3096_v46 = vand.u32 2147483647, %v2226_v38 }
  0x5d   : > { %1679 = vpow2.f32 %v426_v47  ;;  %v432_v62 = vmul.f32 1.442695, %v411_v61  ;;  %v3097_v51 = vand.u32 2147483647, %v2233_v36  ;;  %v3098_v7 = vand.u32 2147483647, %v2237_v43 }
  0x5e   : > { %v413_v42 = vmul.f32 -2.0, %v3095_v32  ;;  %v414_v37 = vmul.f32 -2.0, %v3096_v46  ;;  %1681 = vpow2.f32 %v428_v45  ;;  %v434_v35 = vmul.f32 1.442695, %v412_v49 }
  0x5f   : > { %v415_v40 = vmul.f32 -2.0, %v3097_v51  ;;  %v416_v15 = vmul.f32 -2.0, %v3098_v7  ;;  %1683 = vpow2.f32 %v430_v39  ;;  %v3099_v32 = vand.u32 2147483647, %v2242_v41 }
  0x60   : > { %v436_v14 = vmul.f32 1.442695, %v413_v42  ;;  %v2273_v46 = vadd.f32 -1.0, %v355_v50  ;;  %v3100_v61 = vand.u32 2147483647, %v2245_v34  ;;  %1685 = vpow2.f32 %v432_v62 }
  0x61   : > { %v417_v60 = vmul.f32 -2.0, %v3099_v32  ;;  %v438_v63 = vmul.f32 1.442695, %v414_v37  ;;  %v3101_v45 = vand.u32 2147483647, %v2250_v33  ;;  %1687 = vpow2.f32 %v434_v35 }
  0x62   : > { %v418_v47 = vmul.f32 -2.0, %v3100_v61  ;;  %v440_v58 = vmul.f32 1.442695, %v415_v40  ;;  %v3102_v6 = vand.u32 2147483647, %v2252_v55  ;;  %1689 = vpow2.f32 %v436_v14 }
  0x63   : > { %v419_v51 = vmul.f32 -2.0, %v3101_v45  ;;  %v442_v49 = vmul.f32 1.442695, %v416_v15  ;;  %v444_v39 = vmul.f32 1.442695, %v417_v60  ;;  %1691 = vpow2.f32 %v438_v63 }
  0x64   : > { %v420_v7 = vmul.f32 -2.0, %v3102_v6  ;;  %v3025_v50 = vand.u32 2147483647, %v2273_v46  ;;  %v446_v42 = vmul.f32 1.442695, %v418_v47  ;;  %1693 = vpow2.f32 %v440_v58 }
  0x65   : > { %v2281_v32 = vpop.eup %1675  ;;  %v3103_v62 = vand.u32 2147483647, %v2193_v53  ;;  %v448_v40 = vmul.f32 1.442695, %v419_v51  ;;  %v3104_v6 = vand.u32 2147483647, %v2195_v54  ;;  %1695 = vpow2.f32 %v442_v49 }
  0x66   : > { %v2284_v61 = vpop.eup %1677  ;;  %v3105_v15 = vand.u32 2147483647, %v2198_v56  ;;  %v450_v63 = vmul.f32 1.442695, %v420_v7  ;;  %v3106_v53 = vand.u32 2147483647, %v2200_v57  ;;  %1697 = vpow2.f32 %v444_v39 }
  0x67   : > { %v2288_v37 = vadd.f32 -0.6931472, %v3103_v62  ;;  %v2290_v45 = vpop.eup %1679  ;;  %v2294_v14 = vadd.f32 -0.6931472, %v3104_v6  ;;  %v3107_v58 = vand.u32 2147483647, %v2203_v59  ;;  %1699 = vpow2.f32 %v446_v42 }
  0x68   : > { %v2298_v60 = vadd.f32 -0.6931472, %v3105_v15  ;;  %v2300_v35 = vpop.eup %1681  ;;  %v2304_v47 = vadd.f32 -0.6931472, %v3106_v53  ;;  %v454_v54 = vadd.f32 1.0, %v2281_v32  ;;  %v421_v7 = vmul.f32 -2.0, %v3025_v50 }
  0x69   : > { %v2308_v51 = vadd.f32 -0.6931472, %v3107_v58  ;;  %v2311_v62 = vpop.eup %1683  ;;  %v3108_v56 = vand.u32 2147483647, %v2209_v48  ;;  %v463_v57 = vadd.f32 1.0, %v2284_v61  ;;  %1701 = vpow2.f32 %v448_v40 }
  0x6a   : > { %v3109_v49 = vand.u32 2147483647, %v2215_v52  ;;  %v457_v39 = vmul.f32 -0.5, %v2281_v32  ;;  %v472_v15 = vadd.f32 1.0, %v2290_v45  ;;  %v2326_v53 = vpop.eup %1685  ;;  %v3110_v48 = vand.u32 2147483647, %v2221_v44 }
  0x6b   : > { %v2315_v6 = vadd.f32 -0.6931472, %v3108_v56  ;;  %v3111_v56 = vand.u32 2147483647, %v2226_v38  ;;  %1703 = vpow2.f32 %v450_v63  ;;  %v481_v52 = vadd.f32 1.0, %v2300_v35 }
  0x6c   : > { %v2322_v59 = vadd.f32 -0.6931472, %v3109_v49  ;;  %v2330_v58 = vadd.f32 -0.6931472, %v3110_v48  ;;  %v3112_v49 = vand.u32 2147483647, %v2233_v36  ;;  %1705 = vlog2.f32 %v454_v54  ;;  %v2346_v48 = vpop.eup %1687 }
  0x6d   : > { %v2334_v42 = vadd.f32 -0.6931472, %v3111_v56  ;;  %v3113_v50 = vand.u32 2147483647, %v2237_v43  ;;  %v490_v44 = vadd.f32 1.0, %v2311_v62  ;;  %1707 = vlog2.f32 %v463_v57  ;;  %v2350_v56 = vpop.eup %1689 }
  0x6e   : > { %v2339_v40 = vadd.f32 -0.6931472, %v3112_v49  ;;  %v452_v5 = vmul.f32 1.442695, %v421_v7  ;;  %v460_v38 = vand.u32 2147483647, %v2281_v32  ;;  %1709 = vlog2.f32 %v472_v15 }
  0x6f   : > { %v2343_v13 = vadd.f32 -0.6931472, %v3113_v50  ;;  %v466_v63 = vmul.f32 -0.5, %v2284_v61  ;;  %v458_v36 = vadd.f32 1.0, %v457_v39  ;;  %v475_v49 = vmul.f32 -0.5, %v2290_v45  ;;  %v2354_v50 = vpop.eup %1691 }
  0x70   : > { %v499_v43 = vadd.f32 1.0, %v2326_v53  ;;  %v3114_v54 = vand.u32 2147483647, %v2242_v41  ;;  %v3115_v7 = vand.u32 2147483647, %v2245_v34  ;;  %1711 = vlog2.f32 %v481_v52  ;;  %v2365_v11 = vpop.eup %1693 }
  0x71   : > { %v484_v57 = vmul.f32 -0.5, %v2300_v35  ;;  %v469_v39 = vand.u32 2147483647, %v2284_v61  ;;  %1713 = vlog2.f32 %v490_v44  ;;  %v493_v15 = vmul.f32 -0.5, %v2311_v62  ;;  %v2370_v10 = vpop.eup %1695 }
  0x72   : > { %v2358_v12 = vadd.f32 -0.6931472, %v3114_v54  ;;  %v2362_v4 = vadd.f32 -0.6931472, %v3115_v7  ;;  %v508_v3 = vadd.f32 1.0, %v2346_v48  ;;  %1715 = vpow2.f32 %v452_v5  ;;  %v2374_v52 = vpop.eup %1697 }
  0x73   : > { %v467_v41 = vadd.f32 1.0, %v466_v63  ;;  %v478_v34 = vand.u32 2147483647, %v2290_v45  ;;  %v502_v54 = vmul.f32 -0.5, %v2326_v53  ;;  %v2377_v7 = vmul.f32 %v2281_v32, %v458_v36  ;;  %v2383_v9 = vpop.eup %1699 }
  0x74   : > { %vm2379_vm0 = vcmp.lt.f32.partialorder %v460_v38, 0.0004427343  ;;  %v476_v44 = vadd.f32 1.0, %v475_v49  ;;  %1717 = vlog2.f32 %v499_v43  ;;  %v485_v1 = vadd.f32 1.0, %v484_v57  ;;  %v2388_v30 = vpop.eup %1701 }
  0x75   : > { %v487_v5 = vand.u32 2147483647, %v2300_v35  ;;  %v496_v63 = vand.u32 2147483647, %v2311_v62  ;;  %v511_v31 = vmul.f32 -0.5, %v2346_v48  ;;  %v494_v38 = vadd.f32 1.0, %v493_v15  ;;  %v2396_v43 = vpop.eup %1703 }
  0x76   : > { %vm2390_vm1 = vcmp.lt.f32.partialorder %v469_v39, 0.0004427343  ;;  %v505_v36 = vand.u32 2147483647, %v2326_v53  ;;  %1719 = vlog2.f32 %v508_v3  ;;  %v517_v49 = vadd.f32 1.0, %v2350_v56  ;;  %v1706_v27 = vpop.eup %1705 }
  0x77   : > { %v2399_v57 = vmul.f32 %v2284_v61, %v467_v41  ;;  %vm2401_vm2 = vcmp.lt.f32.partialorder %v478_v34, 0.0004427343  ;;  %v503_v28 = vadd.f32 1.0, %v502_v54  ;;  %v520_v39 = vmul.f32 -0.5, %v2350_v56  ;;  %v1708_v24 = vpop.eup %1707 }
  0x78   : > { %v2407_v15 = vmul.f32 %v2290_v45, %v476_v44  ;;  %v514_v3 = vand.u32 2147483647, %v2346_v48  ;;  %v526_v26 = vadd.f32 1.0, %v2354_v50  ;;  %v529_v25 = vmul.f32 -0.5, %v2354_v50  ;;  %v1710_v54 = vpop.eup %1709 }
  0x79   : > { %v2413_v61 = vmul.f32 %v2300_v35, %v485_v1  ;;  %vm2415_vm3 = vcmp.lt.f32.partialorder %v487_v5, 0.0004427343  ;;  %vm2419_vm4 = vcmp.lt.f32.partialorder %v496_v63, 0.0004427343  ;;  %v512_v45 = vadd.f32 1.0, %v511_v31 }
  0x7a   : > { %v2424_v44 = vmul.f32 %v2311_v62, %v494_v38  ;;  %vm2426_vm5 = vcmp.lt.f32.partialorder %v505_v36, 0.0004427343  ;;  %1721 = vlog2.f32 %v517_v49  ;;  %v535_v1 = vadd.f32 1.0, %v2365_v11  ;;  %v1712_v35 = vpop.eup %1711 }
  0x7b   : > { %v456_v5 = vmul.f32 0.6931472, %v1706_v27  ;;  %v2432_v22 = vmul.f32 %v2326_v53, %v503_v28  ;;  %v521_v63 = vadd.f32 1.0, %v520_v39  ;;  %v538_v21 = vmul.f32 -0.5, %v2365_v11  ;;  %v1714_v31 = vpop.eup %1713 }
  0x7c   : > { %vm2435_vm6 = vcmp.lt.f32.partialorder %v514_v3, 0.0004427343  ;;  %v523_v62 = vand.u32 2147483647, %v2350_v56  ;;  %1723 = vlog2.f32 %v526_v26  ;;  %v530_v38 = vadd.f32 1.0, %v529_v25  ;;  %v2441_v49 = vpop.eup %1715 }
  0x7d   : > { %v544_v36 = vadd.f32 1.0, %v2370_v10  ;;  %v465_v27 = vmul.f32 0.6931472, %v1708_v24  ;;  %v474_v8 = vmul.f32 0.6931472, %v1710_v54  ;;  %v2444_v28 = vmul.f32 %v2346_v48, %v512_v45 }
  0x7e   : > { %v547_v53 = vmul.f32 -0.5, %v2370_v10  ;;  %v1718_v39 = vpop.eup %1717  ;;  %v483_v3 = vmul.f32 0.6931472, %v1712_v35  ;;  %v532_v0 = vand.u32 2147483647, %v2354_v50  ;;  %1725 = vlog2.f32 %v535_v1 }
  0x7f   : > { %v553_v26 = vadd.f32 1.0, %v2374_v52  ;;  %v462_v25 = vsel %vm2379_vm0, %v2377_v7, %v456_v5  ;;  %v492_v19 = vmul.f32 0.6931472, %v1714_v31  ;;  %v2453_v24 = vmul.f32 %v2350_v56, %v521_v63 }
  0x80   : > { %v539_v48 = vadd.f32 1.0, %v538_v21  ;;  %v1720_v45 = vpop.eup %1719  ;;  %vm2455_vm8 = vcmp.lt.f32.partialorder %v523_v62, 0.0004427343  ;;  %v2460_v35 = vmul.f32 %v2354_v50, %v530_v38  ;;  %v541_v1 = vand.u32 2147483647, %v2365_v11 }
  0x81   : > { %1727 = vlog2.f32 %v544_v36  ;;  %v562_v18 = vadd.f32 1.0, %v2383_v9  ;;  %v471_v2 = vsel %vm2390_vm1, %v2399_v57, %v465_v27  ;;  %v480_v21 = vsel %vm2401_vm2, %v2407_v15, %v474_v8 }
  0x82   : > { %v501_v56 = vmul.f32 0.6931472, %v1718_v39  ;;  %v548_v7 = vadd.f32 1.0, %v547_v53  ;;  %v489_v50 = vsel %vm2415_vm3, %v2413_v61, %v483_v3  ;;  %vm2473_vm9 = vcmp.lt.f32.partialorder %v532_v0, 0.0004427343 }
  0x83   : > { %v550_v63 = vand.u32 2147483647, %v2370_v10  ;;  %1729 = vlog2.f32 %v553_v26  ;;  %v571_v32 = vadd.f32 1.0, %v2388_v30  ;;  %v498_v29 = vsel %vm2419_vm4, %v2424_v44, %v492_v19 }
  0x84   : > { %v510_v8 = vmul.f32 0.6931472, %v1720_v45  ;;  %v2483_v57 = vmul.f32 %v2365_v11, %v539_v48  ;;  %v556_v15 = vmul.f32 -0.5, %v2374_v52  ;;  %v1722_v61 = vpop.eup %1721  ;;  %vm2486_vm10 = vcmp.lt.f32.partialorder %v541_v1, 0.0004427343 }
  0x85   : > { %1731 = vlog2.f32 %v562_v18  ;;  %v580_v41 = vadd.f32 1.0, %v2396_v43  ;;  %v598_v31 = vadd.f32 %v2288_v37, %v462_v25  ;;  %v599_v62 = vadd.f32 %v2294_v14, %v471_v2 }
  0x86   : > { %v507_v19 = vsel %vm2426_vm5, %v2432_v22, %v501_v56  ;;  %v2497_v11 = vmul.f32 %v2370_v10, %v548_v7  ;;  %v559_v34 = vand.u32 2147483647, %v2374_v52  ;;  %v600_v44 = vadd.f32 %v2298_v60, %v480_v21  ;;  %v1724_v38 = vpop.eup %1723 }
  0x87   : > { %vm2501_vm11 = vcmp.lt.f32.partialorder %v550_v63, 0.0004427343  ;;  %1733 = vlog2.f32 %v571_v32  ;;  %v589_v37 = vadd.f32 1.0, %v2441_v49  ;;  %v601_v14 = vadd.f32 %v2304_v47, %v489_v50 }
  0x88   : > { %v516_v22 = vsel %vm2435_vm6, %v2444_v28, %v510_v8  ;;  %v519_v10 = vmul.f32 0.6931472, %v1722_v61  ;;  %v557_v23 = vadd.f32 1.0, %v556_v15  ;;  %v565_v36 = vmul.f32 -0.5, %v2383_v9  ;;  %v1726_v27 = vpop.eup %1725 }
  0x89   : > { %1735 = vlog2.f32 %v580_v41  ;;  %v602_v60 = vadd.f32 %v2308_v51, %v498_v29  ;;  %v615_v53 = vsel %vm614_vm7, %v598_v31, 0.0  ;;  %v616_v39 = vsel %vm614_vm7, %v599_v62, 0.0 }
  0x8a   : > { %v528_v3 = vmul.f32 0.6931472, %v1724_v38  ;;  %v568_v26 = vand.u32 2147483647, %v2383_v9  ;;  %v617_v47 = vadd.f32 %v616_v39, %v615_v53  ;;  %v618_v25 = vsel %vm614_vm7, %v600_v44, 0.0 }
  0x8b   : > { %v1728_v20 = vpop.eup %1727  ;;  %v574_v28 = vmul.f32 -0.5, %v2388_v30  ;;  %1737 = vlog2.f32 %v589_v37  ;;  %v603_v48 = vadd.f32 %v2315_v6, %v507_v19  ;;  %v620_v45 = vsel %vm614_vm7, %v601_v14, 0.0 }
  0x8c   : > { %v525_v51 = vsel %vm2455_vm8, %v2453_v24, %v519_v10  ;;  %v537_v1 = vmul.f32 0.6931472, %v1726_v27  ;;  %vm2522_vm12 = vcmp.lt.f32.partialorder %v559_v34, 0.0004427343  ;;  %v619_v21 = vadd.f32 %v618_v25, %v617_v47 }
  0x8d   : > { %v1730_v56 = vpop.eup %1729  ;;  %v558_v7 = vmul.f32 %v2374_v52, %v557_v23  ;;  %v566_v50 = vadd.f32 1.0, %v565_v36  ;;  %v604_v63 = vadd.f32 %v2322_v59, %v516_v22  ;;  %v622_v6 = vsel %vm614_vm7, %v602_v60, 0.0 }
  0x8e   : > { %v534_v32 = vsel %vm2473_vm9, %v2460_v35, %v528_v3  ;;  %v546_v54 = vmul.f32 0.6931472, %v1728_v20  ;;  %v583_v24 = vmul.f32 -0.5, %v2396_v43  ;;  %v621_v29 = vadd.f32 %v620_v45, %v619_v21 }
  0x8f   : > { %v1732_v8 = vpop.eup %1731  ;;  %vm2533_vm13 = vcmp.lt.f32.partialorder %v568_v26, 0.0004427343  ;;  %v575_v61 = vadd.f32 1.0, %v574_v28  ;;  %v605_v52 = vadd.f32 %v2330_v58, %v525_v51  ;;  %v624_v59 = vsel %vm614_vm7, %v603_v48, 0.0 }
  0x90   : > { %v543_v41 = vsel %vm2486_vm10, %v2483_v57, %v537_v1  ;;  %v555_v5 = vmul.f32 0.6931472, %v1730_v56  ;;  %v592_v35 = vmul.f32 -0.5, %v2441_v49  ;;  %v623_v31 = vadd.f32 %v622_v6, %v621_v29 }
  0x91   : > { %v1734_v62 = vpop.eup %1733  ;;  %v567_v19 = vmul.f32 %v2383_v9, %v566_v50  ;;  %v577_v34 = vand.u32 2147483647, %v2388_v30  ;;  %v606_v44 = vadd.f32 %v2334_v42, %v534_v32  ;;  %v626_v38 = vsel %vm614_vm7, %v604_v63, 0.0 }
  0x92   : > { %v552_v58 = vsel %vm2501_vm11, %v2497_v11, %v546_v54  ;;  %v564_v37 = vmul.f32 0.6931472, %v1732_v8  ;;  %v584_v0 = vadd.f32 1.0, %v583_v24  ;;  %v625_v57 = vadd.f32 %v624_v59, %v623_v31 }
  0x93   : > { %v1736_v14 = vpop.eup %1735  ;;  %v576_v22 = vmul.f32 %v2388_v30, %v575_v61  ;;  %v586_v10 = vand.u32 2147483647, %v2396_v43  ;;  %v607_v9 = vadd.f32 %v2339_v40, %v543_v41  ;;  %v628_v23 = vsel %vm614_vm7, %v605_v52, 0.0 }
  0x94   : > { %v561_v42 = vsel %vm2522_vm12, %v558_v7, %v555_v5  ;;  %v573_v36 = vmul.f32 0.6931472, %v1734_v62  ;;  %v593_v27 = vadd.f32 1.0, %v592_v35  ;;  %v627_v60 = vadd.f32 %v626_v38, %v625_v57 }
  0x95   : > { %v1738_v18 = vpop.eup %1737  ;;  %vm2556_vm14 = vcmp.lt.f32.partialorder %v577_v34, 0.0004427343  ;;  %v595_v53 = vand.u32 2147483647, %v2441_v49  ;;  %v608_v30 = vadd.f32 %v2343_v13, %v552_v58  ;;  %v630_v39 = vsel %vm614_vm7, %v606_v44, 0.0 }
  0x96   : > { %v570_v40 = vsel %vm2533_vm13, %v567_v19, %v564_v37  ;;  %v582_v3 = vmul.f32 0.6931472, %v1736_v14  ;;  %v585_v26 = vmul.f32 %v2396_v43, %v584_v0  ;;  %v629_v47 = vadd.f32 %v628_v23, %v627_v60 }
  0x97   : > { %v3144_v25 = vand.u32 2147483647, %v2250_v33  ;;  %vm2568_vm15 = vcmp.lt.f32.partialorder %v586_v10, 0.0004427343  ;;  %v609_v48 = vadd.f32 %v2358_v12, %v561_v42  ;;  %v632_v13 = vsel %vm614_vm7, %v607_v9, 0.0 }
  0x98   : > { %v579_v45 = vsel %vm2556_vm14, %v576_v22, %v573_v36  ;;  %v591_v51 = vmul.f32 0.6931472, %v1738_v18  ;;  %v594_v1 = vmul.f32 %v2441_v49, %v593_v27  ;;  %v631_v2 = vadd.f32 %v630_v39, %v629_v47 }
  0x99   : > { %v1404_v20 = vadd.f32 -0.6931472, %v3144_v25  ;;  %v3147_v43 = vand.u32 2147483647, %v2252_v55  ;;  %vm596_vm0 = vcmp.lt.f32.partialorder %v595_v53, 0.0004427343  ;;  %v610_v33 = vadd.f32 %v2362_v4, %v570_v40 }
  0x9a   : > { %v634_v56 = vsel %vm614_vm7, %v608_v30, 0.0  ;;  %v588_v12 = vsel %vm2568_vm15, %v585_v26, %v582_v3  ;;  %v633_v7 = vadd.f32 %v632_v13, %v631_v2  ;;  %v3148_v50 = vand.u32 2147483647, %v2273_v46 }
  0x9b   : > { %v1405_v21 = vadd.f32 -0.6931472, %v3147_v43  ;;  %v611_v6 = vadd.f32 %v1404_v20, %v579_v45  ;;  %v636_v32 = vsel %vm614_vm7, %v609_v48, 0.0  ;;  %v597_v49 = vsel %vm596_vm0, %v594_v1, %v591_v51 }
  0x9c   : > { %v1406_v63 = vadd.f32 -0.6931472, %v3148_v50  ;;  %v635_v54 = vadd.f32 %v634_v56, %v633_v7  ;;  %v638_v55 = vsel %vm614_vm7, %v610_v33, 0.0 }
  0x9d   : > { %v612_v24 = vadd.f32 %v1405_v21, %v588_v12  ;;  %v640_v4 = vsel %vm614_vm7, %v611_v6, 0.0 }
  0x9e   : > { %v637_v29 = vadd.f32 %v636_v32, %v635_v54  ;;  %v613_v8 = vadd.f32 %v1406_v63, %v597_v49 }
  0x9f   : > { %v642_v61 = vsel %vm614_vm7, %v612_v24, 0.0 }
  0xa0   : > { %v639_v15 = vadd.f32 %v638_v55, %v637_v29  ;;  %v644_v59 = vsel %vm614_vm7, %v613_v8, 0.0 }
  0xa2   : > { %v641_v52 = vadd.f32 %v640_v4, %v639_v15 }
  0xa4   : > { %v643_v46 = vadd.f32 %v642_v61, %v641_v52 }
  0xa6   : > { %v645_v41 = vadd.f32 %v644_v59, %v643_v46 }
  0xa8   : > { %646 = vadd.xlane.f32.xlu0 %v645_v41 }
 0x135   : > { %v647_v5 = vpop.xlane.xlu0 %646 }
 0x136   : > { %v648_v35 = vrot.slane %v647_v5, 4 }
 0x138   : > { %v649_v31 = vadd.f32 %v648_v35, %v647_v5 }
 0x13a   : > { %v650_v62 = vrot.slane %v649_v31, 2 }
 0x13c   : > { %v651_v19 = vadd.f32 %v650_v62, %v649_v31 }
 0x13e   : > { %v652_v34 = vrot.slane %v651_v19, 1 }
 0x140   : > { %v653_v44 = vadd.f32 %v652_v34, %v651_v19 }
 0x142   : > { %1596 = vpush %v653_v44 }
 0x173   : > { %s1597_s10 = spop %1596 }
 0x174   : > { %656 = sst [smem:[#allocation2 + $0x1]] %s1597_s10 }
 0x175 PF: > { %vm657_vm1 = vcmask 261120   ;;  %v1531_v38 = vpack.c.bf16 %v2109_v17, %v2107_v16  ;;  %v3149_v58 = vld [vmem:[#allocation22_spill] sm:$0xff]  ;;  %v3150_v37 = vld [vmem:[#allocation23_spill] sm:$0xff]  ;;  %v3155_v17 = vld [vmem:[#allocation24_spill] sm:$0xff]  ;;  %s1187_s26 = sld [smem:[#allocation2]]  ;;  %p1439_p8 = scmp.ne.s32.totalorder %s1883_s18, 2 }
 0x176   : > { %v1537_v0 = vpack.c.bf16 %v3150_v37, %v3149_v58  ;;  %vm2596_vm2 = vmpackc.low %vm657_vm1, %vm657_vm1  ;;  %v3153_v14 = vld [vmem:[#allocation6_spill] sm:$0xff]  ;;  %v3156_v22 = vld [vmem:[#allocation25_spill] sm:$0xff]  ;;  %s1440_s12 = sld [smem:[#allocation2 + $0x1]] (!%p1439_p8) }
 0x177   : > { %1507 = vmatprep.mubr.msk.f32.mxu0 %vm657_vm1, %v3153_v14  ;;  %1533 = vmatprep.subr.msk.bf16.mxu0 %vm2596_vm2, %v1531_v38  ;;  %v3154_v16 = vld [vmem:[#allocation14_spill] sm:$0xff]  ;;  %v1543_v10 = vpack.c.bf16 %v3156_v22, %v3155_v17  ;;  %v3158_v23 = vld [vmem:[#allocation27_spill] sm:$0xff]  ;;  %v3159_v36 = vld [vmem:[#allocation28_spill] sm:$0xff] }
 0x178   : > { %1579 = vmatprep.subr.msk.bf16.mxu1 %vm2596_vm2, %v1531_v38  ;;  %1536 = vmatpush3.bf16.xpose.msk.msra.mxu0 %vm2596_vm2, %v1531_v38  ;;  %v3157_v9 = vld [vmem:[#allocation26_spill] sm:$0xff]  ;;  %v3160_v27 = vld [vmem:[#allocation29_spill] sm:$0xff]  ;;  %v3162_v11 = vld [vmem:[#allocation31_spill] sm:$0xff] }
 0x179   : > { %1587 = vmatpush3.bf16.xpose.msk.msra.mxu1 %vm2596_vm2, %v1531_v38  ;;  %1539 = vmatprep.subr.msk.bf16.mxu0 %vm2596_vm2, %v1537_v0  ;;  %v1549_v42 = vpack.c.bf16 %v3158_v23, %v3157_v9  ;;  %v1555_v60 = vpack.c.bf16 %v3160_v27, %v3159_v36  ;;  %v3161_v18 = vld [vmem:[#allocation30_spill] sm:$0xff]  ;;  %v3163_v30 = vld [vmem:[#allocation32_spill] sm:$0xff]  ;;  %v3164_v39 = vld [vmem:[#allocation33_spill] sm:$0xff] }
 0x17a   : > { %1580 = vmatprep.subr.msk.bf16.mxu1 %vm2596_vm2, %v1537_v0  ;;  %1519 = vmatprep.mubr.msk.f32.mxu1 %vm657_vm1, %v3154_v16  ;;  %v1561_v53 = vpack.c.bf16 %v3162_v11, %v3161_v18  ;;  %v1567_v40 = vpack.c.bf16 %v3164_v39, %v3163_v30  ;;  %v3165_v3 = vld [vmem:[#allocation34_spill] sm:$0xff]  ;;  %v3166_v26 = vld [vmem:[#allocation35_spill] sm:$0xff]  ;;  %v3169_v28 = vld [vmem:[#allocation8_spill] sm:$0xff] }
 0x17b   : > { %v1573_v47 = vpack.c.bf16 %v3166_v26, %v3165_v3  ;;  %v3167_v25 = vld [vmem:[#allocation7_spill] sm:$0xff]  ;;  %v3170_v48 = vld [vmem:[#allocation16_spill] sm:$0xff]  ;;  %v3171_v13 = vld [vmem:[#allocation9_spill] sm:$0xff] }
 0x17c   : > { %v3168_v20 = vld [vmem:[#allocation15_spill] sm:$0xff]  ;;  %v3172_v45 = vld [vmem:[#allocation17_spill] sm:$0xff]  ;;  %v3173_v51 = vld [vmem:[#allocation10_spill] sm:$0xff] }
 0x17d   : > { %v3174_v1 = vld [vmem:[#allocation18_spill] sm:$0xff]  ;;  %v3175_v2 = vld [vmem:[#allocation11_spill] sm:$0xff]  ;;  %v3177_v21 = vld [vmem:[#allocation12_spill] sm:$0xff] }
 0x17e   : > { %v3176_v43 = vld [vmem:[#allocation19_spill] sm:$0xff]  ;;  %v3178_v33 = vld [vmem:[#allocation20_spill] sm:$0xff]  ;;  %v3179_v56 = vld [vmem:[#allocation13_spill] sm:$0xff] }
 0x17f   : > { %v3180_v12 = vld [vmem:[#allocation21_spill] sm:$0xff] }
 0x180   : > { %1542 = vmatpush3.bf16.xpose.msk.msra.mxu0 %vm2596_vm2, %v1537_v0 }
 0x181   : > { %1588 = vmatpush3.bf16.xpose.msk.msra.mxu1 %vm2596_vm2, %v1537_v0  ;;  %1545 = vmatprep.subr.msk.bf16.mxu0 %vm2596_vm2, %v1543_v10 }
 0x182   : > { %1581 = vmatprep.subr.msk.bf16.mxu1 %vm2596_vm2, %v1543_v10 }
 0x188   : > { %1548 = vmatpush3.bf16.xpose.msk.msra.mxu0 %vm2596_vm2, %v1543_v10 }
 0x189   : > { %1589 = vmatpush3.bf16.xpose.msk.msra.mxu1 %vm2596_vm2, %v1543_v10  ;;  %1551 = vmatprep.subr.msk.bf16.mxu0 %vm2596_vm2, %v1549_v42 }
 0x18a   : > { %1582 = vmatprep.subr.msk.bf16.mxu1 %vm2596_vm2, %v1549_v42 }
 0x190   : > { %1554 = vmatpush3.bf16.xpose.msk.msra.mxu0 %vm2596_vm2, %v1549_v42 }
 0x191   : > { %1590 = vmatpush3.bf16.xpose.msk.msra.mxu1 %vm2596_vm2, %v1549_v42  ;;  %1557 = vmatprep.subr.msk.bf16.mxu0 %vm2596_vm2, %v1555_v60 }
 0x192   : > { %1583 = vmatprep.subr.msk.bf16.mxu1 %vm2596_vm2, %v1555_v60 }
 0x198   : > { %1560 = vmatpush3.bf16.xpose.msk.msra.mxu0 %vm2596_vm2, %v1555_v60 }
 0x199   : > { %1591 = vmatpush3.bf16.xpose.msk.msra.mxu1 %vm2596_vm2, %v1555_v60  ;;  %1563 = vmatprep.subr.msk.bf16.mxu0 %vm2596_vm2, %v1561_v53 }
 0x19a   : > { %1584 = vmatprep.subr.msk.bf16.mxu1 %vm2596_vm2, %v1561_v53 }
 0x1a0   : > { %1566 = vmatpush3.bf16.xpose.msk.msra.mxu0 %vm2596_vm2, %v1561_v53 }
 0x1a1   : > { %1592 = vmatpush3.bf16.xpose.msk.msra.mxu1 %vm2596_vm2, %v1561_v53  ;;  %1569 = vmatprep.subr.msk.bf16.mxu0 %vm2596_vm2, %v1567_v40 }
 0x1a2   : > { %1585 = vmatprep.subr.msk.bf16.mxu1 %vm2596_vm2, %v1567_v40 }
 0x1a8   : > { %1572 = vmatpush3.bf16.xpose.msk.msra.mxu0 %vm2596_vm2, %v1567_v40 }
 0x1a9   : > { %1593 = vmatpush3.bf16.xpose.msk.msra.mxu1 %vm2596_vm2, %v1567_v40  ;;  %1575 = vmatprep.subr.msk.bf16.mxu0 %vm2596_vm2, %v1573_v47 }
 0x1aa   : > { %1586 = vmatprep.subr.msk.bf16.mxu1 %vm2596_vm2, %v1573_v47 }
 0x1b0   : > { %1578 = vmatpush3.bf16.xpose.msk.msra.mxu0 %vm2596_vm2, %v1573_v47 }
 0x1b1   : > { %1594 = vmatpush3.bf16.xpose.msk.msra.mxu1 %vm2596_vm2, %v1573_v47 }
 0x1b7   : > { %1508 = vmatmul.mubr.msk.f32.vlgmr.msra.gmra.mrb[0].mxu0 %vm657_vm1, %v3167_v25 }
 0x1b8   : > { %1520 = vmatmul.mubr.msk.f32.vlgmr.msra.gmra.mrb[0].mxu1 %vm657_vm1, %v3168_v20  ;;  %1510 = vmatprep.mubr.msk.f32.mxu0 %vm657_vm1, %v3169_v28 }
 0x1b9   : > { %1522 = vmatprep.mubr.msk.f32.mxu1 %vm657_vm1, %v3170_v48 }
 0x1bb   : > { %1511 = vmatmul.mubr.msk.f32.gmra.mrb[2].mxu0 %vm657_vm1, %v3171_v13 }
 0x1bc   : > { %1523 = vmatmul.mubr.msk.f32.gmra.mrb[2].mxu1 %vm657_vm1, %v3172_v45  ;;  %1513 = vmatprep.mubr.msk.f32.mxu0 %vm657_vm1, %v3173_v51  ;;  %v3181_v45 = vld [vmem:[#allocation37_spill] sm:$0xff] }
 0x1bd   : > { %1525 = vmatprep.mubr.msk.f32.mxu1 %vm657_vm1, %v3174_v1 }
 0x1bf   : > { %1514 = vmatmul.mubr.msk.f32.gmra.mrb[4].mxu0 %vm657_vm1, %v3175_v2 }
 0x1c0   : > { %1526 = vmatmul.mubr.msk.f32.gmra.mrb[4].mxu1 %vm657_vm1, %v3176_v43  ;;  %1516 = vmatprep.mubr.msk.f32.mxu0 %vm657_vm1, %v3177_v21 }
 0x1c1   : > { %1528 = vmatprep.mubr.msk.f32.mxu1 %vm657_vm1, %v3178_v33 }
 0x1c3   : > { %1517 = vmatmul.mubr.msk.f32.gmra.mrb[6].mxu0 %vm657_vm1, %v3179_v56 }
 0x1c4   : > { %1529 = vmatmul.mubr.msk.f32.gmra.mrb[6].mxu1 %vm657_vm1, %v3180_v12 }
 0x28a   : > { %v1509_v7 = vpop.f32.mrb[0].mxu0 }
 0x28b   : > { %v1521_v50 = vpop.f32.mrb[0].mxu1  ;;  %v2708_v63 = vmul.f32 0.5, %v1509_v7  ;;  %v820_v6 = vpop.f32.mrb[1].mxu0 }
 0x28c   : > { %v860_v32 = vpop.f32.mrb[1].mxu1  ;;  %v2710_v49 = vmul.f32 0.5, %v820_v6  ;;  %v2741_v60 = vmul.f32 0.5, %v1521_v50  ;;  %v3182_v50 = vld [vmem:[#allocation36_spill] sm:$0xff] }
 0x28d   : > { %v916_v54 = vand.u32 2147483647, %v2708_v63  ;;  %v2744_v30 = vmul.f32 0.5, %v860_v32  ;;  %v1124_v20 = vmax.f32 %v2708_v63, 0.0  ;;  %v1156_v51 = vmul.f32 %v2708_v63, %v3181_v45 }
 0x28e   : > { %v915_v24 = vand.u32 2147483647, %v2710_v49  ;;  %v1512_v55 = vpop.f32.mrb[2].mxu0  ;;  %v924_v3 = vand.u32 2147483647, %v2741_v60  ;;  %v1123_v2 = vmax.f32 %v2710_v49, 0.0  ;;  %v1155_v6 = vmul.f32 %v2710_v49, %v3182_v50 }
 0x28f   : > { %v2714_v29 = vpop.f32.mrb[2].mxu1  ;;  %v932_v8 = vsub.f32 0.0, %v916_v54  ;;  %v830_v4 = vpop.f32.mrb[3].mxu0  ;;  %v2718_v52 = vmul.f32 0.5, %v1512_v55  ;;  %v923_v48 = vand.u32 2147483647, %v2744_v30 }
 0x290   : > { %v2716_v15 = vpop.f32.mrb[3].mxu1  ;;  %v931_v61 = vsub.f32 0.0, %v915_v24  ;;  %v2723_v62 = vmul.f32 0.5, %v830_v4  ;;  %v940_v56 = vsub.f32 0.0, %v924_v3 }
 0x291   : > { %v949_v59 = vmul.f32 1.442695, %v932_v8  ;;  %v918_v41 = vand.u32 2147483647, %v2718_v52  ;;  %v939_v55 = vsub.f32 0.0, %v923_v48  ;;  %v2758_v4 = vmul.f32 0.5, %v2716_v15 }
 0x292   : > { %v947_v46 = vmul.f32 1.442695, %v931_v61  ;;  %v1515_v5 = vpop.f32.mrb[4].mxu0  ;;  %v917_v38 = vand.u32 2147483647, %v2723_v62 }
 0x293   : > { %1739 = vpow2.f32 %v949_v59  ;;  %v2721_v35 = vpop.f32.mrb[4].mxu1  ;;  %v934_v31 = vsub.f32 0.0, %v918_v41  ;;  %v840_v19 = vpop.f32.mrb[5].mxu0  ;;  %v2736_v17 = vmul.f32 0.5, %v1515_v5  ;;  %v965_v59 = vmul.f32 1.442695, %v940_v56 }
 0x294   : > { %v2725_v34 = vpop.f32.mrb[5].mxu1  ;;  %1741 = vpow2.f32 %v947_v46  ;;  %v933_v0 = vsub.f32 0.0, %v917_v38  ;;  %v2752_v43 = vmul.f32 0.5, %v840_v19  ;;  %v2762_v5 = vmul.f32 0.5, %v2714_v29 }
 0x295   : > { %v953_v44 = vmul.f32 1.442695, %v934_v31  ;;  %v920_v42 = vand.u32 2147483647, %v2736_v17  ;;  %v2787_v45 = vmul.f32 0.5, %v2721_v35 }
 0x296   : > { %v2728_v58 = vpop.f32.mrb[6].mxu0  ;;  %v951_v16 = vmul.f32 1.442695, %v933_v0  ;;  %v919_v61 = vand.u32 2147483647, %v2752_v43 }
 0x297   : > { %v2730_v37 = vpop.f32.mrb[6].mxu1  ;;  %1743 = vpow2.f32 %v953_v44  ;;  %v2732_v57 = vpop.f32.mrb[7].mxu0  ;;  %v936_v11 = vsub.f32 0.0, %v920_v42  ;;  %v926_v29 = vand.u32 2147483647, %v2762_v5 }
 0x298   : > { %v2734_v14 = vpop.f32.mrb[7].mxu1  ;;  %1745 = vpow2.f32 %v951_v16  ;;  %v1126_v16 = vmax.f32 %v2718_v52, 0.0  ;;  %v928_v35 = vand.u32 2147483647, %v2787_v45 }
 0x299   : > { %v957_v25 = vmul.f32 1.442695, %v936_v11  ;;  %v2773_v11 = vmul.f32 0.5, %v2728_v58  ;;  %v3185_v58 = vld [vmem:[#allocation38_spill] sm:$0xff] }
 0x29d   : > { %v1740_v22 = vpop.eup %1739 }
 0x29e   : > { %v988_v10 = vadd.f32 1.0, %v1740_v22  ;;  %v1742_v9 = vpop.eup %1741  ;;  %v991_v27 = vmul.f32 -0.5, %v1740_v22  ;;  %v994_v47 = vand.u32 2147483647, %v1740_v22 }
 0x29f   : > { %v979_v23 = vadd.f32 1.0, %v1742_v9  ;;  %v982_v53 = vmul.f32 -0.5, %v1742_v9  ;;  %v985_v1 = vand.u32 2147483647, %v1742_v9 }
 0x2a0   : > { %1747 = vlog2.f32 %v988_v10  ;;  %v992_v40 = vadd.f32 1.0, %v991_v27  ;;  %vm995_vm3 = vcmp.lt.f32.partialorder %v994_v47, 0.0004427343  ;;  %v963_v10 = vmul.f32 1.442695, %v939_v55 }
 0x2a1   : > { %v2739_v36 = vpop.eup %1743  ;;  %1749 = vlog2.f32 %v979_v23  ;;  %v983_v28 = vadd.f32 1.0, %v982_v53  ;;  %vm986_vm4 = vcmp.lt.f32.partialorder %v985_v1, 0.0004427343  ;;  %v935_v23 = vsub.f32 0.0, %v919_v61 }
 0x2a2   : > { %v1006_v18 = vadd.f32 1.0, %v2739_v36  ;;  %v1746_v39 = vpop.eup %1745  ;;  %v993_v33 = vmul.f32 %v1740_v22, %v992_v40  ;;  %v1009_v12 = vmul.f32 -0.5, %v2739_v36  ;;  %v1012_v44 = vand.u32 2147483647, %v2739_v36  ;;  %v3187_v40 = vld [vmem:[#allocation45_spill] sm:$0xff] }
 0x2a3   : > { %v997_v26 = vadd.f32 1.0, %v1746_v39  ;;  %v1000_v32 = vmul.f32 -0.5, %v1746_v39  ;;  %v984_v63 = vmul.f32 %v1742_v9, %v983_v28  ;;  %v1003_v22 = vand.u32 2147483647, %v1746_v39 }
 0x2a4   : > { %1751 = vlog2.f32 %v1006_v18  ;;  %v1010_v41 = vadd.f32 1.0, %v1009_v12  ;;  %v925_v9 = vand.u32 2147483647, %v2758_v4  ;;  %v2770_v18 = vmul.f32 0.5, %v2725_v34 }
 0x2a5   : > { %1753 = vlog2.f32 %v997_v26  ;;  %v1001_v38 = vadd.f32 1.0, %v1000_v32  ;;  %vm2775_vm5 = vcmp.lt.f32.partialorder %v1012_v44, 0.0004427343  ;;  %vm1004_vm6 = vcmp.lt.f32.partialorder %v1003_v22, 0.0004427343 }
 0x2a6   : > { %1755 = vpow2.f32 %v957_v25  ;;  %v1011_v27 = vmul.f32 %v2739_v36, %v1010_v41  ;;  %v1125_v36 = vmax.f32 %v2723_v62, 0.0  ;;  %v955_v25 = vmul.f32 1.442695, %v935_v23 }
 0x2a7   : > { %v1002_v26 = vmul.f32 %v1746_v39, %v1001_v38  ;;  %1757 = vpow2.f32 %v965_v59  ;;  %v1157_v28 = vmul.f32 %v2723_v62, %v3185_v58  ;;  %v941_v48 = vsub.f32 0.0, %v925_v9 }
 0x2a8   : > { %1759 = vpow2.f32 %v955_v25  ;;  %v927_v39 = vand.u32 2147483647, %v2770_v18  ;;  %v922_v1 = vand.u32 2147483647, %v2773_v11  ;;  %v942_v12 = vsub.f32 0.0, %v926_v29 }
 0x2a9   : > { %1761 = vpow2.f32 %v963_v10  ;;  %v967_v62 = vmul.f32 1.442695, %v941_v48  ;;  %v2796_v32 = vmul.f32 0.5, %v2730_v37  ;;  %v2802_v55 = vmul.f32 0.5, %v2734_v14 }
 0x2aa   : > { %v1748_v13 = vpop.eup %1747  ;;  %v944_v59 = vsub.f32 0.0, %v928_v35  ;;  %v1134_v48 = vmax.f32 %v2762_v5, 0.0  ;;  %v1128_v35 = vmax.f32 %v2736_v17, 0.0 }
 0x2ab   : > { %v990_v21 = vmul.f32 0.6931472, %v1748_v13  ;;  %v1750_v7 = vpop.eup %1749  ;;  %v930_v37 = vand.u32 2147483647, %v2796_v32 }
 0x2ac   : > { %v981_v24 = vmul.f32 0.6931472, %v1750_v7  ;;  %v938_v7 = vsub.f32 0.0, %v922_v1  ;;  %v973_v38 = vmul.f32 1.442695, %v944_v59 }
 0x2ad   : > { %v996_v54 = vsel %vm995_vm3, %v993_v33, %v990_v21  ;;  %v3186_v33 = vld [vmem:[#allocation39_spill] sm:$0xff] }
 0x2ae   : > { %v1140_v8 = vadd.f32 %v1124_v20, %v996_v54  ;;  %v987_v46 = vsel %vm986_vm4, %v984_v63, %v981_v24  ;;  %v1752_v49 = vpop.eup %1751  ;;  %v1158_v56 = vmul.f32 %v2718_v52, %v3186_v33  ;;  %v961_v24 = vmul.f32 1.442695, %v938_v7 }
 0x2af   : > { %v1139_v19 = vadd.f32 %v1123_v2, %v987_v46  ;;  %v1008_v0 = vmul.f32 0.6931472, %v1752_v49  ;;  %v1754_v42 = vpop.eup %1753  ;;  %v2799_v63 = vmul.f32 0.5, %v2732_v57  ;;  %v969_v52 = vmul.f32 1.442695, %v942_v12 }
 0x2b0   : > { %v1172_v31 = vsub.f32 %v1140_v8, %v1156_v51  ;;  %v999_v3 = vmul.f32 0.6931472, %v1754_v42  ;;  %v2782_v20 = vpop.eup %1755  ;;  %v929_v57 = vand.u32 2147483647, %v2802_v55 }
 0x2b1   : > { %v1171_v15 = vsub.f32 %v1139_v19, %v1155_v6  ;;  %v1014_v47 = vsel %vm2775_vm5, %v1011_v27, %v1008_v0  ;;  %v1024_v21 = vadd.f32 1.0, %v2782_v20  ;;  %v943_v6 = vsub.f32 0.0, %v927_v39  ;;  %v2808_v41 = vpop.eup %1757  ;;  %v3189_v39 = vld [vmem:[#allocation47_spill] sm:$0xff] }
 0x2b2   : > { %v1005_v34 = vsel %vm1004_vm6, %v1002_v26, %v999_v3  ;;  %v1142_v51 = vadd.f32 %v1126_v16, %v1014_v47  ;;  %v921_v61 = vand.u32 2147483647, %v2799_v63  ;;  %v946_v0 = vsub.f32 0.0, %v930_v37  ;;  %v3188_v47 = vld [vmem:[#allocation44_spill] sm:$0xff] }
 0x2b3   : > { %v1188_v53 = vadd.f32 %v1172_v31, %v1171_v15  ;;  %v1141_v13 = vadd.f32 %v1125_v36, %v1005_v34  ;;  %1763 = vlog2.f32 %v1024_v21  ;;  %v971_v46 = vmul.f32 1.442695, %v943_v6  ;;  %v1760_v31 = vpop.eup %1759  ;;  %v3190_v6 = vld [vmem:[#allocation41_spill] sm:$0xff] }
 0x2b4   : > { %v1174_v54 = vsub.f32 %v1142_v51, %v1158_v56  ;;  %1765 = vpow2.f32 %v961_v24  ;;  %v937_v49 = vsub.f32 0.0, %v921_v61  ;;  %v1015_v14 = vadd.f32 1.0, %v1760_v31  ;;  %v2811_v44 = vpop.eup %1761 }
 0x2b5   : > { %v1173_v2 = vsub.f32 %v1141_v13, %v1157_v28  ;;  %1767 = vpow2.f32 %v967_v62  ;;  %v945_v16 = vsub.f32 0.0, %v929_v57  ;;  %v1060_v22 = vadd.f32 1.0, %v2808_v41 }
 0x2b6   : > { %1769 = vpow2.f32 %v969_v52  ;;  %v959_v19 = vmul.f32 1.442695, %v937_v49  ;;  %v1027_v15 = vmul.f32 -0.5, %v2782_v20  ;;  %v1051_v9 = vadd.f32 1.0, %v2811_v44 }
 0x2b7   : > { %v1189_v50 = vadd.f32 %v1188_v53, %v1173_v2  ;;  %1771 = vpow2.f32 %v971_v46  ;;  %v975_v10 = vmul.f32 1.442695, %v945_v16  ;;  %v1018_v42 = vmul.f32 -0.5, %v1760_v31 }
 0x2b8   : > { %1773 = vlog2.f32 %v1015_v14  ;;  %v977_v27 = vmul.f32 1.442695, %v946_v0  ;;  %v1132_v53 = vmax.f32 %v2741_v60, 0.0  ;;  %v2821_v3 = vmul.f32 %v2741_v60, %v3187_v40 }
 0x2b9   : > { %v2804_v8 = vadd.f32 %v1189_v50, %v1174_v54  ;;  %1775 = vpow2.f32 %v959_v19  ;;  %v1131_v26 = vmax.f32 %v2744_v30, 0.0  ;;  %v2826_v36 = vmul.f32 %v2744_v30, %v3188_v47 }
 0x2ba   : > { %1777 = vpow2.f32 %v973_v38  ;;  %v1028_v25 = vadd.f32 1.0, %v1027_v15  ;;  %v1063_v28 = vmul.f32 -0.5, %v2808_v41  ;;  %v1030_v13 = vand.u32 2147483647, %v2782_v20  ;;  %v3193_v15 = vld [vmem:[#allocation40_spill] sm:$0xff] }
 0x2bb   : > { %1779 = vlog2.f32 %v1060_v22  ;;  %v2836_v51 = vmul.f32 %v2762_v5, %v3189_v39  ;;  %v1019_v2 = vadd.f32 1.0, %v1018_v42  ;;  %v1054_v33 = vmul.f32 -0.5, %v2811_v44 }
 0x2bc   : > { %1781 = vpow2.f32 %v975_v10  ;;  %v1133_v56 = vmax.f32 %v2758_v4, 0.0  ;;  %v1021_v12 = vand.u32 2147483647, %v1760_v31  ;;  %v1029_v50 = vmul.f32 %v2782_v20, %v1028_v25 }
 0x2bd   : > { %v1764_v23 = vpop.eup %1763  ;;  %1783 = vlog2.f32 %v1051_v9  ;;  %v1160_v54 = vmul.f32 %v2736_v17, %v3190_v6  ;;  %v1064_v52 = vadd.f32 1.0, %v1063_v28  ;;  %v1066_v61 = vand.u32 2147483647, %v2808_v41 }
 0x2be   : > { %v2816_v29 = vpop.eup %1765  ;;  %v1026_v1 = vmul.f32 0.6931472, %v1764_v23  ;;  %1785 = vpow2.f32 %v977_v27  ;;  %vm2850_vm7 = vcmp.lt.f32.partialorder %v1030_v13, 0.0004427343  ;;  %v1127_v46 = vmax.f32 %v2752_v43, 0.0 }
 0x2bf   : > { %v1042_v34 = vadd.f32 1.0, %v2816_v29  ;;  %v2829_v58 = vpop.eup %1767  ;;  %v1057_v49 = vand.u32 2147483647, %v2811_v44  ;;  %v1020_v14 = vmul.f32 %v1760_v31, %v1019_v2  ;;  %v1055_v17 = vadd.f32 1.0, %v1054_v33 }
 0x2c0   : > { %v2838_v21 = vpop.eup %1769  ;;  %v1069_v7 = vadd.f32 1.0, %v2829_v58  ;;  %v1032_v20 = vsel %vm2850_vm7, %v1029_v50, %v1026_v1  ;;  %vm1022_vm8 = vcmp.lt.f32.partialorder %v1021_v12, 0.0004427343  ;;  %v1159_v10 = vmul.f32 %v2752_v43, %v3193_v15 }
 0x2c1   : > { %1787 = vlog2.f32 %v1042_v34  ;;  %v2842_v62 = vpop.eup %1771  ;;  %v1078_v19 = vadd.f32 1.0, %v2838_v21  ;;  %v1081_v16 = vmul.f32 -0.5, %v2838_v21  ;;  %v1144_v23 = vadd.f32 %v1128_v35, %v1032_v20 }
 0x2c2   : > { %v1774_v24 = vpop.eup %1773  ;;  %1789 = vlog2.f32 %v1069_v7  ;;  %v1087_v31 = vadd.f32 1.0, %v2842_v62  ;;  %v2871_v40 = vmul.f32 %v2808_v41, %v1064_v52  ;;  %vm2873_vm9 = vcmp.lt.f32.partialorder %v1057_v49, 0.0004427343 }
 0x2c3   : > { %v2855_v37 = vpop.eup %1775  ;;  %v1017_v57 = vmul.f32 0.6931472, %v1774_v24  ;;  %v1072_v25 = vmul.f32 -0.5, %v2829_v58  ;;  %v1045_v34 = vmul.f32 -0.5, %v2816_v29  ;;  %v1056_v28 = vmul.f32 %v2811_v44, %v1055_v17 }
 0x2c4   : > { %v1033_v38 = vadd.f32 1.0, %v2855_v37  ;;  %v2862_v0 = vpop.eup %1777  ;;  %v1082_v2 = vadd.f32 1.0, %v1081_v16  ;;  %v1084_v41 = vand.u32 2147483647, %v2838_v21  ;;  %v1075_v33 = vand.u32 2147483647, %v2829_v58 }
 0x2c5   : > { %v1023_v22 = vsel %vm1022_vm8, %v1020_v14, %v1017_v57  ;;  %v1780_v9 = vpop.eup %1779  ;;  %v1096_v13 = vadd.f32 1.0, %v2862_v0  ;;  %v1036_v12 = vmul.f32 -0.5, %v2855_v37  ;;  %v1176_v50 = vsub.f32 %v1144_v23, %v1160_v54  ;;  %v3198_v54 = vld [vmem:[#allocation46_spill] sm:$0xff] }
 0x2c6   : > { %v1143_v42 = vadd.f32 %v1127_v46, %v1023_v22  ;;  %1791 = vlog2.f32 %v1033_v38  ;;  %v2868_v27 = vpop.eup %1781  ;;  %v1062_v6 = vmul.f32 0.6931472, %v1780_v9  ;;  %v1073_v52 = vadd.f32 1.0, %v1072_v25 }
 0x2c7   : > { %v1784_v43 = vpop.eup %1783  ;;  %1793 = vlog2.f32 %v1078_v19  ;;  %v1105_v44 = vadd.f32 1.0, %v2868_v27  ;;  %v1046_v59 = vadd.f32 1.0, %v1045_v34  ;;  %v1048_v46 = vand.u32 2147483647, %v2816_v29 }
 0x2c8   : > { %v1175_v39 = vsub.f32 %v1143_v42, %v1159_v10  ;;  %v2881_v1 = vpop.eup %1785  ;;  %1795 = vlog2.f32 %v1087_v31  ;;  %v1053_v24 = vmul.f32 0.6931472, %v1784_v43  ;;  %vm2890_vm10 = vcmp.lt.f32.partialorder %v1066_v61, 0.0004427343 }
 0x2c9   : > { %1797 = vlog2.f32 %v1096_v13  ;;  %v1114_v20 = vadd.f32 1.0, %v2881_v1  ;;  %v1037_v17 = vadd.f32 1.0, %v1036_v12  ;;  %v2899_v19 = vmul.f32 %v2838_v21, %v1082_v2 }
 0x2ca   : > { %v1191_v35 = vadd.f32 %v2804_v8, %v1175_v39  ;;  %v2896_v8 = vmul.f32 %v2758_v4, %v3198_v54  ;;  %vm2901_vm11 = vcmp.lt.f32.partialorder %v1084_v41, 0.0004427343  ;;  %v1039_v16 = vand.u32 2147483647, %v2855_v37 }
 0x2cb   : > { %v1788_v7 = vpop.eup %1787  ;;  %1799 = vlog2.f32 %v1105_v44  ;;  %v1059_v22 = vsel %vm2873_vm9, %v1056_v28, %v1053_v24  ;;  %vm2908_vm12 = vcmp.lt.f32.partialorder %v1075_v33, 0.0004427343  ;;  %v1090_v10 = vmul.f32 -0.5, %v2842_v62 }
 0x2cc   : > { %v1192_v49 = vadd.f32 %v1191_v35, %v1176_v50  ;;  %v1044_v14 = vmul.f32 0.6931472, %v1788_v7  ;;  %v1790_v61 = vpop.eup %1789  ;;  %v1047_v21 = vmul.f32 %v2816_v29, %v1046_v59  ;;  %v1068_v23 = vsel %vm2890_vm10, %v2871_v40, %v1062_v6 }
 0x2cd   : > { %v1074_v42 = vmul.f32 %v2829_v58, %v1073_v52  ;;  %vm2918_vm13 = vcmp.lt.f32.partialorder %v1048_v46, 0.0004427343  ;;  %1801 = vlog2.f32 %v1114_v20  ;;  %v1099_v47 = vmul.f32 -0.5, %v2862_v0  ;;  %v3206_v46 = vld [vmem:[#allocation43_spill] sm:$0xff] }
 0x2ce   : > { %v1050_v25 = vsel %vm2918_vm13, %v1047_v21, %v1044_v14  ;;  %v1038_v29 = vmul.f32 %v2855_v37, %v1037_v17  ;;  %v1147_v28 = vadd.f32 %v1131_v26, %v1059_v22  ;;  %v1130_v40 = vmax.f32 %v2773_v11, 0.0  ;;  %v3205_v37 = vld [vmem:[#allocation42_spill] sm:$0xff] }
 0x2cf   : > { %vm1040_vm14 = vcmp.lt.f32.partialorder %v1039_v16, 0.0004427343  ;;  %v1129_v58 = vmax.f32 %v2799_v63, 0.0  ;;  %v1071_v13 = vmul.f32 0.6931472, %v1790_v61  ;;  %v1091_v39 = vadd.f32 1.0, %v1090_v10 }
 0x2d0   : > { %v1792_v9 = vpop.eup %1791  ;;  %v1108_v41 = vmul.f32 -0.5, %v2868_v27  ;;  %v1093_v12 = vand.u32 2147483647, %v2842_v62  ;;  %v1146_v7 = vadd.f32 %v1130_v40, %v1050_v25  ;;  %v1161_v35 = vmul.f32 %v2799_v63, %v3205_v37  ;;  %v3215_v37 = vld [vmem:[#allocation50_spill] sm:$0xff] }
 0x2d1   : > { %v1035_v34 = vmul.f32 0.6931472, %v1792_v9  ;;  %v1794_v43 = vpop.eup %1793  ;;  %v1148_v30 = vadd.f32 %v1132_v53, %v1068_v23  ;;  %v1100_v44 = vadd.f32 1.0, %v1099_v47  ;;  %v1117_v6 = vmul.f32 -0.5, %v2881_v1 }
 0x2d2   : > { %v1796_v33 = vpop.eup %1795  ;;  %v1080_v26 = vmul.f32 0.6931472, %v1794_v43  ;;  %v1179_v52 = vsub.f32 %v1147_v28, %v2826_v36  ;;  %v1102_v59 = vand.u32 2147483647, %v2862_v0  ;;  %v1162_v20 = vmul.f32 %v2773_v11, %v3206_v46 }
 0x2d3   : > { %v1041_v2 = vsel %vm1040_vm14, %v1038_v29, %v1035_v34  ;;  %v1798_v24 = vpop.eup %1797  ;;  %v1077_v54 = vsel %vm2908_vm12, %v1074_v42, %v1071_v13  ;;  %v1089_v63 = vmul.f32 0.6931472, %v1796_v33  ;;  %v1092_v60 = vmul.f32 %v2842_v62, %v1091_v39 }
 0x2d4   : > { %v1145_v50 = vadd.f32 %v1129_v58, %v1041_v2  ;;  %v1109_v53 = vadd.f32 1.0, %v1108_v41  ;;  %vm2944_vm15 = vcmp.lt.f32.partialorder %v1093_v12, 0.0004427343  ;;  %v1178_v16 = vsub.f32 %v1146_v7, %v1162_v20  ;;  %v3214_v41 = vld [vmem:[#allocation49_spill] sm:$0xff] }
 0x2d5   : > { %v1800_v14 = vpop.eup %1799  ;;  %v1111_v61 = vand.u32 2147483647, %v2868_v27  ;;  %v1086_v11 = vsel %vm2901_vm11, %v2899_v19, %v1080_v26  ;;  %v1098_v22 = vmul.f32 0.6931472, %v1798_v24  ;;  %v1101_v15 = vmul.f32 %v2862_v0, %v1100_v44 }
 0x2d6   : > { %v1177_v57 = vsub.f32 %v1145_v50, %v1161_v35  ;;  %v1118_v10 = vadd.f32 1.0, %v1117_v6  ;;  %v1149_v62 = vadd.f32 %v1133_v56, %v1077_v54  ;;  %vm2955_vm0 = vcmp.lt.f32.partialorder %v1102_v59, 0.0004427343 }
 0x2d7   : > { %v1802_v21 = vpop.eup %1801  ;;  %v1180_v42 = vsub.f32 %v1148_v30, %v2821_v3  ;;  %v1095_v19 = vsel %vm2944_vm15, %v1092_v60, %v1089_v63  ;;  %v1107_v38 = vmul.f32 0.6931472, %v1800_v14  ;;  %v1110_v0 = vmul.f32 %v2868_v27, %v1109_v53 }
 0x2d8   : > { %v1193_v36 = vadd.f32 %v1192_v49, %v1177_v57  ;;  %v1120_v49 = vand.u32 2147483647, %v2881_v1  ;;  %v1150_v31 = vadd.f32 %v1134_v48, %v1086_v11  ;;  %v1135_v4 = vmax.f32 %v2770_v18, 0.0  ;;  %v3213_v48 = vld [vmem:[#allocation48_spill] sm:$0xff] }
 0x2d9   : > { %vm2967_vm1 = vcmp.lt.f32.partialorder %v1111_v61, 0.0004427343  ;;  %v1104_v25 = vsel %vm2955_vm0, %v1101_v15, %v1098_v22  ;;  %v1136_v3 = vmax.f32 %v2787_v45, 0.0  ;;  %v1116_v34 = vmul.f32 0.6931472, %v1802_v21 }
 0x2da   : > { %v1194_v23 = vadd.f32 %v1193_v36, %v1178_v16  ;;  %v1119_v29 = vmul.f32 %v2881_v1, %v1118_v10  ;;  %v1181_v27 = vsub.f32 %v1149_v62, %v2896_v8  ;;  %v1151_v43 = vadd.f32 %v1135_v4, %v1095_v19 }
 0x2db   : > { %vm1121_vm2 = vcmp.lt.f32.partialorder %v1120_v49, 0.0004427343  ;;  %v1167_v28 = vmul.f32 %v2770_v18, %v3213_v48  ;;  %v1113_v40 = vsel %vm2967_vm1, %v1110_v0, %v1107_v38  ;;  %v1182_v58 = vsub.f32 %v1150_v31, %v2836_v51  ;;  %v3216_v51 = vld [vmem:[#allocation51_spill] sm:$0xff] }
 0x2dc   : > { %v1195_v56 = vadd.f32 %v1194_v23, %v1179_v52  ;;  %v1152_v13 = vadd.f32 %v1136_v3, %v1104_v25  ;;  %v1137_v39 = vmax.f32 %v2802_v55, 0.0  ;;  %v1168_v1 = vmul.f32 %v2787_v45, %v3214_v41 }
 0x2dd   : > { %v1122_v33 = vsel %vm1121_vm2, %v1119_v29, %v1116_v34  ;;  %v1183_v8 = vsub.f32 %v1151_v43, %v1167_v28  ;;  %v1138_v12 = vmax.f32 %v2796_v32, 0.0  ;;  %v1169_v18 = vmul.f32 %v2802_v55, %v3215_v37 }
 0x2de   : > { %v1196_v5 = vadd.f32 %v1195_v56, %v1180_v42  ;;  %v1153_v7 = vadd.f32 %v1137_v39, %v1113_v40  ;;  %v1184_v30 = vsub.f32 %v1152_v13, %v1168_v1  ;;  %v1170_v44 = vmul.f32 %v2796_v32, %v3216_v51 }
 0x2df   : > { %v1154_v35 = vadd.f32 %v1138_v12, %v1122_v33  ;;  %v1223_v55 = vstv (!%p1439_p8), %s1440_s12 }
 0x2e0   : > { %v1197_v2 = vadd.f32 %v1196_v5, %v1181_v27  ;;  %v1185_v6 = vsub.f32 %v1153_v7, %v1169_v18  ;;  %1224 = vst [vmem:[%s2103_s23] sm:$0xff] (!%p1439_p8), %v1223_v55 }
 0x2e1   : > { %v1186_v52 = vsub.f32 %v1154_v35, %v1170_v44 }
 0x2e2   : > { %v1198_v50 = vadd.f32 %v1197_v2, %v1182_v58 }
 0x2e4   : > { %v1199_v26 = vadd.f32 %v1198_v50, %v1183_v8 }
 0x2e6   : > { %v1200_v24 = vadd.f32 %v1199_v26, %v1184_v30 }
 0x2e8   : > { %v1201_v59 = vadd.f32 %v1200_v24, %v1185_v6 }
 0x2ea   : > { %v1202_v45 = vadd.f32 %v1201_v59, %v1186_v52 }
 0x2ec   : > { %1203 = vadd.xlane.f32.xlu0 %v1202_v45 }
 0x379   : > { %v1204_v46 = vpop.xlane.xlu0 %1203 }
 0x37a   : > { %v1205_v20 = vrot.slane %v1204_v46, 4 }
 0x37c   : > { %v1206_v57 = vadd.f32 %v1205_v20, %v1204_v46 }
 0x37e   : > { %v1207_v54 = vrot.slane %v1206_v57, 2 }
 0x380   : > { %v1208_v63 = vadd.f32 %v1207_v54, %v1206_v57 }
 0x382   : > { %v1209_v60 = vrot.slane %v1208_v63, 1 }
 0x384   : > { %v1210_v53 = vadd.f32 %v1209_v60, %v1208_v63 }
 0x386   : > { %1598 = vpush %v1210_v53 }
 0x3b4   : > { %1218 = sbr.rel (%p1439_p8) target bundleno = 963 (0x3c3), region = 44 }
 0x3b7   : > { %s1599_s27 = spop %1598 }
 0x3b8   : > { %s1212_s6 = sadd.f32 %s1599_s27, %s1187_s26 }
 0x3ba   : > { %1214 = sst [smem:[#allocation2]] %s1212_s6 }
 0x3bb   : > { %s1219_s11 = sld [smem:[#allocation2]] }
 0x3c1   : > { %v1220_v32 = vstv %s1219_s11 }
 0x3c2   : > { %1221 = vst [vmem:[%s2098_s7] sm:$0xff] %v1220_v32 }
 0x3c3 PF: > { %s18_s22 = sadd.s32 1, %s1899_s22   ;;  %s3217_s15 = smov %s1875_s16 }
 0x3c4   : > { %p15_p9 = scmp.ge.s32.totalorder %s18_s22, 11   ;;  %s3218_s16 = smov %s1879_s17 }
 0x3c5   : > { %s3219_s17 = smov %s1998_s9  ;;  %s3220_s18 = smov %s1891_s20 }
 0x3c6   : > { %s3221_s19 = smov %s1895_s21  ;;  %s3222_s20 = smov %s3225_s24 }
 0x3c7   : > { %s3223_s21 = smov %s3229_s25  ;;  %17 = sbr.rel (!%p15_p9) target bundleno = 5 (0x5), region = 101 }
 0x3ce   :  { %1258 = vsyncpa [#allocation4], 1 }
 0x3cf   :  { %1260 = vsyncpa [#allocation4 + $0x1], 1 }

</bundles_post_ra>
